<compile_context>
chip_gen: v6e
topology: v6e:2x2x1
jax: 0.10.0
libtpu: 0.0.40
codegen_flags: <defaults>
</compile_context>

<pallas_src>
import functools
import sys

import jax
import jax.numpy as jnp
from jax.experimental import pallas as pl
from jax.experimental.pallas import tpu as pltpu


def _round_up(a, b):
    return (a + b - 1) // b * b


def _vmem_capacity():
    """Per-core VMEM bytes; conservative 64 MiB fallback (v7x-sized)."""
    try:
        info = pltpu.get_tpu_info()
        cap = getattr(info, "vmem_capacity_bytes", None)
        if cap:
            return int(cap)
    except Exception:
        pass
    return 64 << 20


_HAS_BUFFERED = hasattr(pl, "Buffered")


def _weight_spec(arr, mode):
    """Grid-invariant whole-array BlockSpec (constant block index)."""
    ndim = arr.ndim
    index_map = lambda i, _n=ndim: (0,) * _n
    if mode == "buffered1":
        # Single-buffer the resident weights: no double allocation, one DMA.
        return pl.BlockSpec(arr.shape, index_map, pipeline_mode=pl.Buffered(1))
    return pl.BlockSpec(arr.shape, index_map)


def _with_weight_mode_fallback(run):
    """Try single-buffered weights first; log (stderr) and retry on failure."""
    modes = (["buffered1"] if _HAS_BUFFERED else []) + ["default"]
    for k, mode in enumerate(modes):
        try:
            return run(mode)
        except Exception as e:
            if k + 1 == len(modes):
                raise
            print(
                f"[transformer_ffn] weight mode '{mode}' failed with "
                f"{type(e).__name__}: {e}; retrying with '{modes[k + 1]}' "
                f"(weights will be double-buffered).",
                file=sys.stderr,
            )


# ---------------------------------------------------------------------------
# Kernels
# ---------------------------------------------------------------------------

def _ffn_kernel(x_ref, *refs, num_mid):
    """Fused FFN.  refs = (w1, b1, [wm_i, bm_i]*, w2, b2, out)."""
    o_ref = refs[-1]
    w_refs = refs[:-1]

    h = x_ref[...]
    if h.dtype != jnp.bfloat16:          # direct-f32 input path: cast on VPU
        h = h.astype(jnp.bfloat16)

    n_layers = num_mid + 2
    for layer in range(n_layers):        # static unroll (num_mid is Python int)
        w_ref = w_refs[2 * layer]
        b_ref = w_refs[2 * layer + 1]
        # bf16 operands on the MXU, f32 accumulation, f32 bias.
        y = jnp.dot(h, w_ref[...], preferred_element_type=jnp.float32) + b_ref[...]
        if layer < n_layers - 1:
            # Fused bias + ReLU + bf16 downcast: live intermediate stays bf16.
            h = jnp.maximum(y, 0.0).astype(jnp.bfloat16)
        else:
            # lin2, no activation; dropout is identity in eval mode.
            o_ref[...] = y.astype(o_ref.dtype)


def _linear_kernel(x_ref, w_ref, b_ref, o_ref, *, relu):
    """Single linear (+ optional ReLU) for the layer-streaming path."""
    x = x_ref[...]
    if x.dtype != jnp.bfloat16:
        x = x.astype(jnp.bfloat16)
    y = jnp.dot(x, w_ref[...], preferred_element_type=jnp.float32) + b_ref[...]
    if relu:
        y = jnp.maximum(y, 0.0)
    o_ref[...] = y.astype(o_ref.dtype)


# ---------------------------------------------------------------------------
# pallas_call wrappers
# ---------------------------------------------------------------------------

def _run_fused(x_in, weight_ops, num_mid, tm, mode, cap, weight_bytes):
    n_pad, k = x_in.shape
    hid_p = weight_ops[0].shape[1]
    out_p = weight_ops[-1].shape[1]

    wb = weight_bytes if mode == "buffered1" else 2 * weight_bytes
    io = 2 * tm * k * x_in.dtype.itemsize + 2 * tm * out_p * 4
    act = tm * hid_p * 2 + tm * max(hid_p, out_p) * 4
    vmem_limit = int(min(0.9 * cap, max(wb + io + 2 * act + (8 << 20), 32 << 20)))

    in_specs = [pl.BlockSpec((tm, k), lambda i: (i, 0))]
    in_specs += [_weight_spec(a, mode) for a in weight_ops]

    return pl.pallas_call(
        functools.partial(_ffn_kernel, num_mid=num_mid),
        out_shape=jax.ShapeDtypeStruct((n_pad, out_p), jnp.float32),
        grid_spec=pltpu.PrefetchScalarGridSpec(
            num_scalar_prefetch=0,
            grid=(n_pad // tm,),
            in_specs=in_specs,
            out_specs=pl.BlockSpec((tm, out_p), lambda i: (i, 0)),
        ),
        # "parallel" lets the token axis shard across v7x's two TensorCores;
        # we keep >= 2 grid steps so both cores get work (CORE_PARALLEL /
        # core_map is the escalation if profiling shows one TC idle).
        compiler_params=pltpu.CompilerParams(
            dimension_semantics=("parallel",),
            vmem_limit_bytes=vmem_limit),
    )(x_in, *weight_ops)


def _linear_call(x2d, w, b, *, relu, out_dtype, tm, mode, cap):
    n_pad, k = x2d.shape
    m = w.shape[1]
    wbytes = int(w.size) * w.dtype.itemsize + int(b.size) * b.dtype.itemsize
    wb = wbytes if mode == "buffered1" else 2 * wbytes
    io = 2 * tm * k * x2d.dtype.itemsize + 2 * tm * m * jnp.dtype(out_dtype).itemsize
    act = tm * m * 4
    vmem_limit = int(min(0.9 * cap, max(wb + io + 2 * act + (8 << 20), 32 << 20)))

    return pl.pallas_call(
        functools.partial(_linear_kernel, relu=relu),
        out_shape=jax.ShapeDtypeStruct((n_pad, m), out_dtype),
        grid_spec=pltpu.PrefetchScalarGridSpec(
            num_scalar_prefetch=0,
            grid=(n_pad // tm,),
            in_specs=[pl.BlockSpec((tm, k), lambda i: (i, 0)),
                      _weight_spec(w, mode),
                      _weight_spec(b, mode)],
            out_specs=pl.BlockSpec((tm, m), lambda i: (i, 0)),
        ),
        compiler_params=pltpu.CompilerParams(
            dimension_semantics=("parallel",),
            vmem_limit_bytes=vmem_limit),
    )(x2d, w, b)


def _run_split(x_in, weight_ops, num_mid, tm, mode, cap):
    """Layer-streaming path: one pallas_call per linear, bf16 intermediates."""
    n_layers = num_mid + 2
    h = x_in
    for li in range(n_layers):
        w, b = weight_ops[2 * li], weight_ops[2 * li + 1]
        last = li == n_layers - 1
        h = _linear_call(h, w, b, relu=not last,
                         out_dtype=jnp.float32 if last else jnp.bfloat16,
                         tm=tm, mode=mode, cap=cap)
    return h


# ---------------------------------------------------------------------------
# Public API
# ---------------------------------------------------------------------------

def prepare_ffn_params(params):
    """One-time weight repack: pad feature dims to multiples of 128, cast
    weights to bf16 (MXU-native), keep biases f32.  Call once; reuse the
    result for every forward (no per-call repack HBM traffic)."""
    w1, b1, wmid, bmid, w2, b2 = params
    in_dim, hid = int(w1.shape[0]), int(w1.shape[1])
    out_dim = int(w2.shape[1])
    num_mid = int(wmid.shape[0])
    in_p = _round_up(in_dim, 128)
    hid_p = _round_up(hid, 128)
    out_p = _round_up(out_dim, 128)

    def pad_w(w, r, c):
        return jnp.zeros((r, c), jnp.bfloat16).at[
            :w.shape[0], :w.shape[1]].set(w.astype(jnp.bfloat16))

    def pad_b(b, c):
        b2d = jnp.asarray(b, jnp.float32).reshape(1, -1)
        return jnp.zeros((1, c), jnp.float32).at[:, :b2d.shape[1]].set(b2d)

    weight_ops = [pad_w(w1, in_p, hid_p), pad_b(b1, hid_p)]
    for i in range(num_mid):
        weight_ops += [pad_w(wmid[i], hid_p, hid_p), pad_b(bmid[i], hid_p)]
    weight_ops += [pad_w(w2, hid_p, out_p), pad_b(b2, out_p)]
    weight_ops = tuple(jax.block_until_ready(a) for a in weight_ops)

    weight_bytes = sum(int(a.size) * a.dtype.itemsize for a in weight_ops)
    return dict(weight_ops=weight_ops, num_mid=num_mid,
                in_dim=in_dim, hid=hid, out_dim=out_dim,
                in_p=in_p, hid_p=hid_p, out_p=out_p,
                weight_bytes=weight_bytes)


def transformer_ffn(x, packed, *, tm=None, force_split=False):
    """x: (batch, seq, in_dim) f32; packed: prepare_ffn_params(...) output.
    Returns (batch, seq, out_dim) f32 (eval-mode forward)."""
    B, S, in_dim = x.shape
    assert in_dim == packed["in_dim"], "input dim mismatch with packed params"
    in_p, hid_p, out_p = packed["in_p"], packed["hid_p"], packed["out_p"]
    out_dim, num_mid = packed["out_dim"], packed["num_mid"]
    weight_ops, weight_bytes = packed["weight_ops"], packed["weight_bytes"]
    n_layers = num_mid + 2

    N = B * S
    cap = _vmem_capacity()

    # Fused resident-weight kernel unless the weights can't sit in VMEM
    # (v7x: 64 MiB/TC) -- then stream one layer per pallas_call.
    split = force_split or (weight_bytes > int(0.45 * cap))

    # Token tile: 512 on 128-MiB VMEM chips (v5e/v6e), 256 on v7x, clamped by
    # the actual footprint next to the resident weights, and kept to >= 2
    # grid steps so both v7x TensorCores get work.
    if tm is None:
        tm = 512 if cap >= (100 << 20) else 256
    if split:
        resident = max(
            int(weight_ops[2 * i].size) * weight_ops[2 * i].dtype.itemsize
            + int(weight_ops[2 * i + 1].size) * weight_ops[2 * i + 1].dtype.itemsize
            for i in range(n_layers))
    else:
        resident = weight_bytes
    per_row = 2 * in_p * 4 + 2 * out_p * 4 + hid_p * 2 + max(hid_p, out_p) * 4
    budget = int(0.7 * cap) - 2 * resident
    if budget > 0:
        tm = min(tm, max(8, (budget // per_row) // 8 * 8))
    else:
        tm = 8
    if N > 8:
        tm = min(tm, _round_up((N + 1) // 2, 8))
    tm = max(8, min(tm, _round_up(N, 8)))
    N_pad = _round_up(N, tm)

    # Input: skip the repack entirely when already lane/tile aligned; the
    # kernel casts f32 -> bf16 after the load.  Otherwise pad once to bf16.
    x2d = x.reshape(N, in_dim)
    if in_p == in_dim and N_pad == N:
        x_in = x2d
    else:
        x_in = jnp.zeros((N_pad, in_p), jnp.bfloat16).at[:N, :in_dim].set(
            x2d.astype(jnp.bfloat16))

    def run(mode):
        if split:
            return _run_split(x_in, weight_ops, num_mid, tm, mode, cap)
        return _run_fused(x_in, weight_ops, num_mid, tm, mode, cap, weight_bytes)

    out2d = _with_weight_mode_fallback(run)

    if N_pad == N and out_p == out_dim:
        return out2d.reshape(B, S, out_dim)          # no pad-slice copy
    return out2d[:N, :out_dim].reshape(B, S, out_dim)


# ---------------------------------------------------------------------------
# Parameter init + pure-JAX reference (PyTorch-equivalent eval forward)
# ---------------------------------------------------------------------------

def init_params(key, in_dim, dim_hidden, out_dim, hidden_layers):
    """Deterministic init mirroring nn.Linear (uniform +-1/sqrt(fan_in)).
    Weights are returned already transposed to (in_features, out_features)."""
    num_mid = hidden_layers - 1
    ks = jax.random.split(key, 2 * (2 + max(num_mid, 0)))

    def lin(kw, kb, fan_in, fan_out):
        bound = 1.0 / jnp.sqrt(jnp.float32(fan_in))
        w = jax.random.uniform(kw, (fan_in, fan_out), jnp.float32, -bound, bound)
        b = jax.random.uniform(kb, (1, fan_out), jnp.float32, -bound, bound)
        return w, b

    w1, b1 = lin(ks[0], ks[1], in_dim, dim_hidden)
    wmids, bmids = [], []
    for i in range(num_mid):
        w, b = lin(ks[2 + 2 * i], ks[3 + 2 * i], dim_hidden, dim_hidden)
        wmids.append(w)
        bmids.append(b)
    w2, b2 = lin(ks[-2], ks[-1], dim_hidden, out_dim)

    if num_mid > 0:
        wmid = jnp.stack(wmids, axis=0)                    # (M, H, H)
        bmid = jnp.stack(bmids, axis=0)                    # (M, 1, H)
    else:
        wmid = jnp.zeros((0, dim_hidden, dim_hidden), jnp.float32)
        bmid = jnp.zeros((0, 1, dim_hidden), jnp.float32)
    return (w1, b1, wmid, bmid, w2, b2)


def ffn_reference(x, params):
    """Pure-JAX f32 reference of the PyTorch forward (eval mode)."""
    w1, b1, wmid, bmid, w2, b2 = params
    h = jnp.maximum(x @ w1 + b1[0], 0.0)
    for i in range(wmid.shape[0]):
        h = jnp.maximum(h @ wmid[i] + bmid[i, 0], 0.0)
    return h @ w2 + b2[0]


if __name__ == "__main__":
    # Test 1: FFN-consistent small shapes (padded features, fused kernel).
    # batch=2, seq=8, in_dim=32, hidden=64, out_dim=32, hidden_layers=3.
    B, S, in_dim, hid, out_dim, layers = 2, 8, 32, 64, 32, 3
    k1, k2, k3, k4 = jax.random.split(jax.random.PRNGKey(0), 4)

    x = jax.random.normal(k1, (B, S, in_dim), dtype=jnp.float32)
    params = init_params(k2, in_dim, hid, out_dim, layers)
    packed = prepare_ffn_params(params)          # one-time weight repack

    out = jax.block_until_ready(transformer_ffn(x, packed))
    ref = ffn_reference(x, params)
    assert out.shape == (B, S, out_dim)
    assert jnp.allclose(out, ref, atol=5e-2, rtol=5e-2), "fused path mismatch"

    # Test 2: lane/tile-aligned shapes -> direct f32 input, exact out_shape.
    x2 = jax.random.normal(k3, (2, 8, 128), dtype=jnp.float32)
    params2 = init_params(k4, 128, 128, 128, 2)
    packed2 = prepare_ffn_params(params2)
    out2 = jax.block_until_ready(transformer_ffn(x2, packed2))
    ref2 = ffn_reference(x2, params2)
    assert out2.shape == (2, 8, 128)
    assert jnp.allclose(out2, ref2, atol=5e-2, rtol=5e-2), "aligned path mismatch"

    # Test 3: layer-streaming path (used when weights exceed ~45% of VMEM).
    out3 = jax.block_until_ready(transformer_ffn(x, packed, force_split=True))
    assert jnp.allclose(out3, ref, atol=5e-2, rtol=5e-2), "split path mismatch"

    print("KERNEL_OK")
</pallas_src>

<mosaic_0001>
module attributes {stable_mosaic.version = 11 : i64} {
  func.func @_ffn_kernel(%arg0: i32, %arg1: memref<8x128xbf16, #tpu.memory_space<vmem>>, %arg2: memref<128x128xbf16, #tpu.memory_space<vmem>>, %arg3: memref<1x128xf32, #tpu.memory_space<vmem>>, %arg4: memref<128x128xbf16, #tpu.memory_space<vmem>>, %arg5: memref<1x128xf32, #tpu.memory_space<vmem>>, %arg6: memref<128x128xbf16, #tpu.memory_space<vmem>>, %arg7: memref<1x128xf32, #tpu.memory_space<vmem>>, %arg8: memref<128x128xbf16, #tpu.memory_space<vmem>>, %arg9: memref<1x128xf32, #tpu.memory_space<vmem>>, %arg10: memref<8x128xf32, #tpu.memory_space<vmem>>) attributes {dimension_semantics = [#tpu.dimension_semantics<parallel>], iteration_bounds = array<i64: 2>, scalar_prefetch = 0 : i64, scratch_operands = 0 : i64, tpu.core_type = #tpu.core_type<tc>, window_params = [{transform_indices = @transform_0, window_bounds = array<i64: 8, 128>}, {pipeline_mode = #tpu.pipeline_mode<synchronous>, transform_indices = @transform_1, window_bounds = array<i64: 128, 128>}, {pipeline_mode = #tpu.pipeline_mode<synchronous>, transform_indices = @transform_2, window_bounds = array<i64: 1, 128>}, {pipeline_mode = #tpu.pipeline_mode<synchronous>, transform_indices = @transform_3, window_bounds = array<i64: 128, 128>}, {pipeline_mode = #tpu.pipeline_mode<synchronous>, transform_indices = @transform_4, window_bounds = array<i64: 1, 128>}, {pipeline_mode = #tpu.pipeline_mode<synchronous>, transform_indices = @transform_5, window_bounds = array<i64: 128, 128>}, {pipeline_mode = #tpu.pipeline_mode<synchronous>, transform_indices = @transform_6, window_bounds = array<i64: 1, 128>}, {pipeline_mode = #tpu.pipeline_mode<synchronous>, transform_indices = @transform_7, window_bounds = array<i64: 128, 128>}, {pipeline_mode = #tpu.pipeline_mode<synchronous>, transform_indices = @transform_8, window_bounds = array<i64: 1, 128>}, {transform_indices = @transform_9, window_bounds = array<i64: 8, 128>}]} {
    %c0 = arith.constant 0 : index
    %c0_0 = arith.constant 0 : index
    %0 = vector.load %arg1[%c0, %c0_0] : memref<8x128xbf16, #tpu.memory_space<vmem>>, vector<8x128xbf16>
    %c0_1 = arith.constant 0 : index
    %c0_2 = arith.constant 0 : index
    %1 = vector.load %arg2[%c0_1, %c0_2] : memref<128x128xbf16, #tpu.memory_space<vmem>>, vector<128x128xbf16>
    %cst = arith.constant dense<0.000000e+00> : vector<8x128xf32>
    %2 = tpu.matmul %0, %1, %cst {dimension_numbers = #tpu.dot_dimension_numbers<[1], [0], [0], [1], [0, 0, 1, 1], [], []>} : vector<8x128xbf16>, vector<128x128xbf16>, vector<8x128xf32> -> vector<8x128xf32>
    %c0_3 = arith.constant 0 : index
    %c0_4 = arith.constant 0 : index
    %3 = vector.load %arg3[%c0_3, %c0_4] : memref<1x128xf32, #tpu.memory_space<vmem>>, vector<1x128xf32>
    %4 = vector.broadcast %3 : vector<1x128xf32> to vector<8x128xf32>
    %5 = arith.addf %2, %4 : vector<8x128xf32>
    %cst_5 = arith.constant 0.000000e+00 : f32
    %6 = vector.broadcast %cst_5 : f32 to vector<8x128xf32>
    %7 = arith.maximumf %5, %6 : vector<8x128xf32>
    %8 = arith.truncf %7 : vector<8x128xf32> to vector<8x128xbf16>
    %c0_6 = arith.constant 0 : index
    %c0_7 = arith.constant 0 : index
    %9 = vector.load %arg4[%c0_6, %c0_7] : memref<128x128xbf16, #tpu.memory_space<vmem>>, vector<128x128xbf16>
    %cst_8 = arith.constant dense<0.000000e+00> : vector<8x128xf32>
    %10 = tpu.matmul %8, %9, %cst_8 {dimension_numbers = #tpu.dot_dimension_numbers<[1], [0], [0], [1], [0, 0, 1, 1], [], []>} : vector<8x128xbf16>, vector<128x128xbf16>, vector<8x128xf32> -> vector<8x128xf32>
    %c0_9 = arith.constant 0 : index
    %c0_10 = arith.constant 0 : index
    %11 = vector.load %arg5[%c0_9, %c0_10] : memref<1x128xf32, #tpu.memory_space<vmem>>, vector<1x128xf32>
    %12 = vector.broadcast %11 : vector<1x128xf32> to vector<8x128xf32>
    %13 = arith.addf %10, %12 : vector<8x128xf32>
    %cst_11 = arith.constant 0.000000e+00 : f32
    %14 = vector.broadcast %cst_11 : f32 to vector<8x128xf32>
    %15 = arith.maximumf %13, %14 : vector<8x128xf32>
    %16 = arith.truncf %15 : vector<8x128xf32> to vector<8x128xbf16>
    %c0_12 = arith.constant 0 : index
    %c0_13 = arith.constant 0 : index
    %17 = vector.load %arg6[%c0_12, %c0_13] : memref<128x128xbf16, #tpu.memory_space<vmem>>, vector<128x128xbf16>
    %cst_14 = arith.constant dense<0.000000e+00> : vector<8x128xf32>
    %18 = tpu.matmul %16, %17, %cst_14 {dimension_numbers = #tpu.dot_dimension_numbers<[1], [0], [0], [1], [0, 0, 1, 1], [], []>} : vector<8x128xbf16>, vector<128x128xbf16>, vector<8x128xf32> -> vector<8x128xf32>
    %c0_15 = arith.constant 0 : index
    %c0_16 = arith.constant 0 : index
    %19 = vector.load %arg7[%c0_15, %c0_16] : memref<1x128xf32, #tpu.memory_space<vmem>>, vector<1x128xf32>
    %20 = vector.broadcast %19 : vector<1x128xf32> to vector<8x128xf32>
    %21 = arith.addf %18, %20 : vector<8x128xf32>
    %cst_17 = arith.constant 0.000000e+00 : f32
    %22 = vector.broadcast %cst_17 : f32 to vector<8x128xf32>
    %23 = arith.maximumf %21, %22 : vector<8x128xf32>
    %24 = arith.truncf %23 : vector<8x128xf32> to vector<8x128xbf16>
    %c0_18 = arith.constant 0 : index
    %c0_19 = arith.constant 0 : index
    %25 = vector.load %arg8[%c0_18, %c0_19] : memref<128x128xbf16, #tpu.memory_space<vmem>>, vector<128x128xbf16>
    %cst_20 = arith.constant dense<0.000000e+00> : vector<8x128xf32>
    %26 = tpu.matmul %24, %25, %cst_20 {dimension_numbers = #tpu.dot_dimension_numbers<[1], [0], [0], [1], [0, 0, 1, 1], [], []>} : vector<8x128xbf16>, vector<128x128xbf16>, vector<8x128xf32> -> vector<8x128xf32>
    %c0_21 = arith.constant 0 : index
    %c0_22 = arith.constant 0 : index
    %27 = vector.load %arg9[%c0_21, %c0_22] : memref<1x128xf32, #tpu.memory_space<vmem>>, vector<1x128xf32>
    %28 = vector.broadcast %27 : vector<1x128xf32> to vector<8x128xf32>
    %29 = arith.addf %26, %28 : vector<8x128xf32>
    %c0_23 = arith.constant 0 : index
    %c0_24 = arith.constant 0 : index
    %30 = vector.load %arg10[%c0_23, %c0_24] : memref<8x128xf32, #tpu.memory_space<vmem>>, vector<8x128xf32>
    tpu.vector_store %arg10[%c0_23, %c0_24], %29 {strides = array<i32>} : memref<8x128xf32, #tpu.memory_space<vmem>>, vector<8x128xf32>,
    return
  }
  func.func @transform_0(%arg0: i32) -> (i32, i32) {
    %c0_i32 = arith.constant 0 : i32
    %c0_i32_0 = arith.constant 0 : i32
    return %arg0, %c0_i32 : i32, i32
  }
  func.func @transform_1(%arg0: i32) -> (i32, i32) {
    %c0_i32 = arith.constant 0 : i32
    %c0_i32_0 = arith.constant 0 : i32
    %c0_i32_1 = arith.constant 0 : i32
    return %c0_i32, %c0_i32_0 : i32, i32
  }
  func.func @transform_2(%arg0: i32) -> (i32, i32) {
    %c0_i32 = arith.constant 0 : i32
    %c0_i32_0 = arith.constant 0 : i32
    %c0_i32_1 = arith.constant 0 : i32
    return %c0_i32, %c0_i32_0 : i32, i32
  }
  func.func @transform_3(%arg0: i32) -> (i32, i32) {
    %c0_i32 = arith.constant 0 : i32
    %c0_i32_0 = arith.constant 0 : i32
    %c0_i32_1 = arith.constant 0 : i32
    return %c0_i32, %c0_i32_0 : i32, i32
  }
  func.func @transform_4(%arg0: i32) -> (i32, i32) {
    %c0_i32 = arith.constant 0 : i32
    %c0_i32_0 = arith.constant 0 : i32
    %c0_i32_1 = arith.constant 0 : i32
    return %c0_i32, %c0_i32_0 : i32, i32
  }
  func.func @transform_5(%arg0: i32) -> (i32, i32) {
    %c0_i32 = arith.constant 0 : i32
    %c0_i32_0 = arith.constant 0 : i32
    %c0_i32_1 = arith.constant 0 : i32
    return %c0_i32, %c0_i32_0 : i32, i32
  }
  func.func @transform_6(%arg0: i32) -> (i32, i32) {
    %c0_i32 = arith.constant 0 : i32
    %c0_i32_0 = arith.constant 0 : i32
    %c0_i32_1 = arith.constant 0 : i32
    return %c0_i32, %c0_i32_0 : i32, i32
  }
  func.func @transform_7(%arg0: i32) -> (i32, i32) {
    %c0_i32 = arith.constant 0 : i32
    %c0_i32_0 = arith.constant 0 : i32
    %c0_i32_1 = arith.constant 0 : i32
    return %c0_i32, %c0_i32_0 : i32, i32
  }
  func.func @transform_8(%arg0: i32) -> (i32, i32) {
    %c0_i32 = arith.constant 0 : i32
    %c0_i32_0 = arith.constant 0 : i32
    %c0_i32_1 = arith.constant 0 : i32
    return %c0_i32, %c0_i32_0 : i32, i32
  }
  func.func @transform_9(%arg0: i32) -> (i32, i32) {
    %c0_i32 = arith.constant 0 : i32
    %c0_i32_0 = arith.constant 0 : i32
    return %arg0, %c0_i32 : i32, i32
  }
}

module attributes {stable_mosaic.version = 11 : i64} {
  func.func @_ffn_kernel(%arg0: i32, %arg1: memref<8x128xbf16, #tpu.memory_space<vmem>>, %arg2: memref<128x128xbf16, #tpu.memory_space<vmem>>, %arg3: memref<1x128xf32, #tpu.memory_space<vmem>>, %arg4: memref<128x128xbf16, #tpu.memory_space<vmem>>, %arg5: memref<1x128xf32, #tpu.memory_space<vmem>>, %arg6: memref<128x128xbf16, #tpu.memory_space<vmem>>, %arg7: memref<1x128xf32, #tpu.memory_space<vmem>>, %arg8: memref<128x128xbf16, #tpu.memory_space<vmem>>, %arg9: memref<1x128xf32, #tpu.memory_space<vmem>>, %arg10: memref<8x128xf32, #tpu.memory_space<vmem>>) attributes {dimension_semantics = [#tpu.dimension_semantics<parallel>], iteration_bounds = array<i64: 2>, scalar_prefetch = 0 : i64, scratch_operands = 0 : i64, tpu.core_type = #tpu.core_type<tc>, window_params = [{transform_indices = @transform_0, window_bounds = array<i64: 8, 128>}, {pipeline_mode = #tpu.pipeline_mode<synchronous>, transform_indices = @transform_1, window_bounds = array<i64: 128, 128>}, {pipeline_mode = #tpu.pipeline_mode<synchronous>, transform_indices = @transform_2, window_bounds = array<i64: 1, 128>}, {pipeline_mode = #tpu.pipeline_mode<synchronous>, transform_indices = @transform_3, window_bounds = array<i64: 128, 128>}, {pipeline_mode = #tpu.pipeline_mode<synchronous>, transform_indices = @transform_4, window_bounds = array<i64: 1, 128>}, {pipeline_mode = #tpu.pipeline_mode<synchronous>, transform_indices = @transform_5, window_bounds = array<i64: 128, 128>}, {pipeline_mode = #tpu.pipeline_mode<synchronous>, transform_indices = @transform_6, window_bounds = array<i64: 1, 128>}, {pipeline_mode = #tpu.pipeline_mode<synchronous>, transform_indices = @transform_7, window_bounds = array<i64: 128, 128>}, {pipeline_mode = #tpu.pipeline_mode<synchronous>, transform_indices = @transform_8, window_bounds = array<i64: 1, 128>}, {transform_indices = @transform_9, window_bounds = array<i64: 8, 128>}]} {
    %c0 = arith.constant 0 : index
    %c0_0 = arith.constant 0 : index
    %0 = vector.load %arg1[%c0, %c0_0] : memref<8x128xbf16, #tpu.memory_space<vmem>>, vector<8x128xbf16>
    %c0_1 = arith.constant 0 : index
    %c0_2 = arith.constant 0 : index
    %1 = vector.load %arg2[%c0_1, %c0_2] : memref<128x128xbf16, #tpu.memory_space<vmem>>, vector<128x128xbf16>
    %cst = arith.constant dense<0.000000e+00> : vector<8x128xf32>
    %2 = tpu.matmul %0, %1, %cst {dimension_numbers = #tpu.dot_dimension_numbers<[1], [0], [0], [1], [0, 0, 1, 1], [], []>} : vector<8x128xbf16>, vector<128x128xbf16>, vector<8x128xf32> -> vector<8x128xf32>
    %c0_3 = arith.constant 0 : index
    %c0_4 = arith.constant 0 : index
    %3 = vector.load %arg3[%c0_3, %c0_4] : memref<1x128xf32, #tpu.memory_space<vmem>>, vector<1x128xf32>
    %4 = vector.broadcast %3 : vector<1x128xf32> to vector<8x128xf32>
    %5 = arith.addf %2, %4 : vector<8x128xf32>
    %cst_5 = arith.constant 0.000000e+00 : f32
    %6 = vector.broadcast %cst_5 : f32 to vector<8x128xf32>
    %7 = arith.maximumf %5, %6 : vector<8x128xf32>
    %8 = arith.truncf %7 : vector<8x128xf32> to vector<8x128xbf16>
    %c0_6 = arith.constant 0 : index
    %c0_7 = arith.constant 0 : index
    %9 = vector.load %arg4[%c0_6, %c0_7] : memref<128x128xbf16, #tpu.memory_space<vmem>>, vector<128x128xbf16>
    %cst_8 = arith.constant dense<0.000000e+00> : vector<8x128xf32>
    %10 = tpu.matmul %8, %9, %cst_8 {dimension_numbers = #tpu.dot_dimension_numbers<[1], [0], [0], [1], [0, 0, 1, 1], [], []>} : vector<8x128xbf16>, vector<128x128xbf16>, vector<8x128xf32> -> vector<8x128xf32>
    %c0_9 = arith.constant 0 : index
    %c0_10 = arith.constant 0 : index
    %11 = vector.load %arg5[%c0_9, %c0_10] : memref<1x128xf32, #tpu.memory_space<vmem>>, vector<1x128xf32>
    %12 = vector.broadcast %11 : vector<1x128xf32> to vector<8x128xf32>
    %13 = arith.addf %10, %12 : vector<8x128xf32>
    %cst_11 = arith.constant 0.000000e+00 : f32
    %14 = vector.broadcast %cst_11 : f32 to vector<8x128xf32>
    %15 = arith.maximumf %13, %14 : vector<8x128xf32>
    %16 = arith.truncf %15 : vector<8x128xf32> to vector<8x128xbf16>
    %c0_12 = arith.constant 0 : index
    %c0_13 = arith.constant 0 : index
    %17 = vector.load %arg6[%c0_12, %c0_13] : memref<128x128xbf16, #tpu.memory_space<vmem>>, vector<128x128xbf16>
    %cst_14 = arith.constant dense<0.000000e+00> : vector<8x128xf32>
    %18 = tpu.matmul %16, %17, %cst_14 {dimension_numbers = #tpu.dot_dimension_numbers<[1], [0], [0], [1], [0, 0, 1, 1], [], []>} : vector<8x128xbf16>, vector<128x128xbf16>, vector<8x128xf32> -> vector<8x128xf32>
    %c0_15 = arith.constant 0 : index
    %c0_16 = arith.constant 0 : index
    %19 = vector.load %arg7[%c0_15, %c0_16] : memref<1x128xf32, #tpu.memory_space<vmem>>, vector<1x128xf32>
    %20 = vector.broadcast %19 : vector<1x128xf32> to vector<8x128xf32>
    %21 = arith.addf %18, %20 : vector<8x128xf32>
    %cst_17 = arith.constant 0.000000e+00 : f32
    %22 = vector.broadcast %cst_17 : f32 to vector<8x128xf32>
    %23 = arith.maximumf %21, %22 : vector<8x128xf32>
    %24 = arith.truncf %23 : vector<8x128xf32> to vector<8x128xbf16>
    %c0_18 = arith.constant 0 : index
    %c0_19 = arith.constant 0 : index
    %25 = vector.load %arg8[%c0_18, %c0_19] : memref<128x128xbf16, #tpu.memory_space<vmem>>, vector<128x128xbf16>
    %cst_20 = arith.constant dense<0.000000e+00> : vector<8x128xf32>
    %26 = tpu.matmul %24, %25, %cst_20 {dimension_numbers = #tpu.dot_dimension_numbers<[1], [0], [0], [1], [0, 0, 1, 1], [], []>} : vector<8x128xbf16>, vector<128x128xbf16>, vector<8x128xf32> -> vector<8x128xf32>
    %c0_21 = arith.constant 0 : index
    %c0_22 = arith.constant 0 : index
    %27 = vector.load %arg9[%c0_21, %c0_22] : memref<1x128xf32, #tpu.memory_space<vmem>>, vector<1x128xf32>
    %28 = vector.broadcast %27 : vector<1x128xf32> to vector<8x128xf32>
    %29 = arith.addf %26, %28 : vector<8x128xf32>
    %c0_23 = arith.constant 0 : index
    %c0_24 = arith.constant 0 : index
    %30 = vector.load %arg10[%c0_23, %c0_24] : memref<8x128xf32, #tpu.memory_space<vmem>>, vector<8x128xf32>
    tpu.vector_store %arg10[%c0_23, %c0_24], %29 {strides = array<i32>} : memref<8x128xf32, #tpu.memory_space<vmem>>, vector<8x128xf32>,
    return
  }
  func.func @transform_0(%arg0: i32) -> (i32, i32) {
    %c0_i32 = arith.constant 0 : i32
    %c0_i32_0 = arith.constant 0 : i32
    return %arg0, %c0_i32 : i32, i32
  }
  func.func @transform_1(%arg0: i32) -> (i32, i32) {
    %c0_i32 = arith.constant 0 : i32
    %c0_i32_0 = arith.constant 0 : i32
    %c0_i32_1 = arith.constant 0 : i32
    return %c0_i32, %c0_i32_0 : i32, i32
  }
  func.func @transform_2(%arg0: i32) -> (i32, i32) {
    %c0_i32 = arith.constant 0 : i32
    %c0_i32_0 = arith.constant 0 : i32
    %c0_i32_1 = arith.constant 0 : i32
    return %c0_i32, %c0_i32_0 : i32, i32
  }
  func.func @transform_3(%arg0: i32) -> (i32, i32) {
    %c0_i32 = arith.constant 0 : i32
    %c0_i32_0 = arith.constant 0 : i32
    %c0_i32_1 = arith.constant 0 : i32
    return %c0_i32, %c0_i32_0 : i32, i32
  }
  func.func @transform_4(%arg0: i32) -> (i32, i32) {
    %c0_i32 = arith.constant 0 : i32
    %c0_i32_0 = arith.constant 0 : i32
    %c0_i32_1 = arith.constant 0 : i32
    return %c0_i32, %c0_i32_0 : i32, i32
  }
  func.func @transform_5(%arg0: i32) -> (i32, i32) {
    %c0_i32 = arith.constant 0 : i32
    %c0_i32_0 = arith.constant 0 : i32
    %c0_i32_1 = arith.constant 0 : i32
    return %c0_i32, %c0_i32_0 : i32, i32
  }
  func.func @transform_6(%arg0: i32) -> (i32, i32) {
    %c0_i32 = arith.constant 0 : i32
    %c0_i32_0 = arith.constant 0 : i32
    %c0_i32_1 = arith.constant 0 : i32
    return %c0_i32, %c0_i32_0 : i32, i32
  }
  func.func @transform_7(%arg0: i32) -> (i32, i32) {
    %c0_i32 = arith.constant 0 : i32
    %c0_i32_0 = arith.constant 0 : i32
    %c0_i32_1 = arith.constant 0 : i32
    return %c0_i32, %c0_i32_0 : i32, i32
  }
  func.func @transform_8(%arg0: i32) -> (i32, i32) {
    %c0_i32 = arith.constant 0 : i32
    %c0_i32_0 = arith.constant 0 : i32
    %c0_i32_1 = arith.constant 0 : i32
    return %c0_i32, %c0_i32_0 : i32, i32
  }
  func.func @transform_9(%arg0: i32) -> (i32, i32) {
    %c0_i32 = arith.constant 0 : i32
    %c0_i32_0 = arith.constant 0 : i32
    return %arg0, %c0_i32 : i32, i32
  }
}

</mosaic_0001>

<bundles_post_ra>
// kernel: tpu_custom_call.1
= control target key start
LH: loop header
LB: loop body
LE: loop exit
PB: predicated region body
PF: predicated region fallthrough
CT: control target
= control target key end

     0   :  { %s1825_s0 = inlined_call_operand.hbm [shape: bf16[16,128], index: 0, kind: input, shape index: {}]   ;;  %s1826_s1 = inlined_call_operand.hbm [shape: bf16[128,128], index: 1, kind: input, shape index: {}]   ;;  %s1827_s2 = inlined_call_operand.vmem [shape: f32[1,128], index: 2, kind: input, shape index: {}]   ;;  %s1828_s3 = inlined_call_operand.hbm [shape: bf16[128,128], index: 3, kind: input, shape index: {}]   ;;  %s1829_s4 = inlined_call_operand.vmem [shape: f32[1,128], index: 4, kind: input, shape index: {}]   ;;  %s1830_s5 = inlined_call_operand.hbm [shape: bf16[128,128], index: 5, kind: input, shape index: {}]   ;;  %s1831_s6 = inlined_call_operand.vmem [shape: f32[1,128], index: 6, kind: input, shape index: {}]   ;;  %s1832_s7 = inlined_call_operand.hbm [shape: bf16[128,128], index: 7, kind: input, shape index: {}]   ;;  %s1833_s8 = inlined_call_operand.vmem [shape: f32[1,128], index: 8, kind: input, shape index: {}]   ;;  %s1834_s9 = inlined_call_operand.hbm [shape: f32[16,128], index: 9, kind: output, shape index: {}]  }
   0x1   :  { %1839 = sst [smem:[#allocation16_spill]] %s1826_s1 }
   0x2   :  { %1840 = sst [smem:[#allocation17_spill]] %s1828_s3 }
   0x3   :  { %1841 = sst [smem:[#allocation18_spill]] %s1830_s5 }
   0x4   :  { %1842 = sst [smem:[#allocation19_spill]] %s1832_s7 }
   0x5   :  { %14 = vsyncpa [#allocation3], 0 }
   0x6   :  { %16 = vsyncpa [#allocation3 + $0x1], 0 }
   0x7   :  { %17 = vsyncpa [#allocation6], 0 }
   0x8   :  { %18 = vsyncpa [#allocation9], 0 }
   0x9   :  { %19 = vsyncpa [#allocation4], 0 }
   0xa   :  { %21 = vsyncpa [#allocation4 + $0x1], 0  ;;  %s1542_s30 = smov 0   ;;  %s1544_s10 = smov 0  }
   0xb   :  { %s1546_s11 = smov 0   ;;  %s1548_s12 = smov 0  }
   0xc LB: > { %s1482_s13 = smov [#allocation5]   ;;  %s1563_s15 = sadd.s32 4294967295, %s1480_s12   ;;  %s1480_s12 = sphi %s1548_s12, %s1866_s12   ;;  %s1476_s11 = sphi %s1546_s11, %s1865_s11   ;;  %s1472_s10 = sphi %s1544_s10, %s1864_s10   ;;  %s1468_s30 = sphi %s1542_s30, %s1863_s30  }
   0xd   : > { %s264_s14 = sshll.u32 %s1482_s13, 4  ;;  %p982_p0 = scmp.ge.s32.totalorder %s1480_s12, 1  ;;  %s265_s14 = int_to_ptr.vmem [resolvable:$true] %s264_s14 }
   0xe   : > { %p1835_p1 = scmp.eq.s32.totalorder %s1563_s15, 0  ;;  %p252_p2 = scmp.lt.s32.totalorder %s1480_s12, 3 }
   0xf   : > { %s1483_s17 = smov [#allocation8]   ;;  %s1484_s20 = smov [#allocation7]  }
  0x10   : > { %p1568_p3 = pnand %p982_p0, %p252_p2  ;;  %s296_s18 = sshll.u32 %s1483_s17, 4  ;;  %s1581_s18 = int_to_ptr.vmem [resolvable:$true] %s296_s18 }
  0x11   : > { %s280_s21 = sshll.u32 %s1484_s20, 4  ;;  %s1287_s22 = scalar_lea.vmem %s265_s14, 1024  ;;  %s1583_s21 = int_to_ptr.vmem [resolvable:$true] %s280_s21 }
  0x12   : > { %s1843_s16 = scalar_select %p1568_p3, 1, 0 }
  0x13   : > { %p1173_p5 = pneg %p1568_p3  ;;  %p1288_p8 = scmp.ne.s32.totalorder %s265_s14, %s1287_s22 }
  0x14   : > { %p1295_p11 = scmp.lt.s32.totalorder %s265_s14, %s265_s14  ;;  %p1296_p12 = scmp.lt.s32.totalorder %s1287_s22, %s1287_s22 }
  0x15   : > { %p1577_p6 = pnand %p1173_p5, %p1835_p1 }
  0x16   : > { %p1297_p13 = por %p1296_p12, %p1295_p11 }
  0x17   : > { %p1278_p7 = pneg %p1577_p6 }
  0x19   : > { %p1290_p9 = pnand %p1288_p8, %p1278_p7 }
  0x1b   : > { %p1291_p10 = pneg %p1290_p9 }
  0x1d   : > { %p1298_p0 = pnand %p1297_p13, %p1291_p10 }
  0x1f   : > { %1301 = shalt.err (!%p1298_p0)
}
  0x20   : > { %s1485_s23 = smov 64   ;;  %s1486_s24 = smov 4  }
  0x21   : > { %s1845_s1 = sld [smem:[#allocation16_spill]]  ;;  %s1313_s27 = scalar_lea.vmem %s1581_s18, 1024 }
  0x22   : > { %p1314_p2 = scmp.ne.s32.totalorder %s1581_s18, %s1313_s27  ;;  %p1321_p9 = scmp.lt.s32.totalorder %s1581_s18, %s1581_s18 }
  0x23   : > { %p1322_p10 = scmp.lt.s32.totalorder %s1313_s27, %s1313_s27 }
  0x24   : > { %p1316_p5 = pnand %p1314_p2, %p1278_p7 }
  0x25   : > { %p1323_p11 = por %p1322_p10, %p1321_p9 }
  0x26   : > { %p1317_p8 = pneg %p1316_p5 }
  0x27   : > { %1176 = dma.hbm_to_vmem [thread:$0]  (!%p1577_p6), %s1845_s1, 1024, %s265_s14, [#allocation6], %s1485_s23, %s1485_s23, %s1486_s24  }
  0x28   : > { %p1324_p12 = pnand %p1323_p11, %p1317_p8 }
  0x2a   : > { %1327 = shalt.err (!%p1324_p12)
}
  0x2b   : > { %s1846_s5 = sld [smem:[#allocation18_spill]]  ;;  %s1339_s13 = scalar_lea.vmem %s1583_s21, 1024 }
  0x2c   : > { %p1340_p13 = scmp.ne.s32.totalorder %s1583_s21, %s1339_s13  ;;  %p1347_p5 = scmp.lt.s32.totalorder %s1583_s21, %s1583_s21 }
  0x2d   : > { %p1348_p8 = scmp.lt.s32.totalorder %s1339_s13, %s1339_s13 }
  0x2e   : > { %p1342_p0 = pnand %p1340_p13, %p1278_p7 }
  0x2f   : > { %p1349_p9 = por %p1348_p8, %p1347_p5 }
  0x30   : > { %p1343_p2 = pneg %p1342_p0 }
  0x31   : > { %1182 = dma.hbm_to_vmem [thread:$0]  (!%p1577_p6), %s1846_s5, 1024, %s1581_s18, [#allocation9], %s1485_s23, %s1485_s23, %s1486_s24  }
  0x32   : > { %p1350_p10 = pnand %p1349_p9, %p1343_p2 }
  0x34   : > { %1353 = shalt.err (!%p1350_p10)
}
  0x35   : > { %s1847_s3 = sld [smem:[#allocation17_spill]]  ;;  %s1487_s18 = smov [#allocation10]  }
  0x36   : > { %s312_s20 = sshll.u32 %s1487_s18, 4  ;;  %s313_s20 = int_to_ptr.vmem [resolvable:$true] %s312_s20 }
  0x37   : > { %s1365_s22 = scalar_lea.vmem %s313_s20, 1024  ;;  %p1373_p0 = scmp.lt.s32.totalorder %s313_s20, %s313_s20 }
  0x38   : > { %p1366_p11 = scmp.ne.s32.totalorder %s313_s20, %s1365_s22  ;;  %p1374_p2 = scmp.lt.s32.totalorder %s1365_s22, %s1365_s22 }
  0x3a   : > { %p1368_p12 = pnand %p1366_p11, %p1278_p7  ;;  %p1375_p5 = por %p1374_p2, %p1373_p0 }
  0x3b   : > { %1179 = dma.hbm_to_vmem [thread:$0]  (!%p1577_p6), %s1847_s3, 1024, %s1583_s21, [#allocation6], %s1485_s23, %s1485_s23, %s1486_s24  }
  0x3c   : > { %p1369_p13 = pneg %p1368_p12 }
  0x3e   : > { %p1376_p8 = pnand %p1375_p5, %p1369_p13 }
  0x40   : > { %1379 = shalt.err (!%p1376_p8)
}
  0x41   : > { %s1848_s7 = sld [smem:[#allocation19_spill]]  ;;  %s981_s19 = sadd.s32 4294967294, %s1480_s12  }
  0x42   : > { %s1643_s26 = sadd.s32 1, %s1480_s12   ;;  %s34_s28 = sadd.s32 1, %s1476_s11 }
  0x43   : > { %s31_s27 = ssub.s32 %s1480_s12, %s1643_s26  ;;  %p41_p9 = scmp.ne.s32.totalorder %s1476_s11, %s1472_s10 }
  0x44   : > { %p32_p7 = scmp.eq.s32.totalorder %s31_s27, 0  ;;  %p42_p10 = scmp.eq.s32.totalorder %s1480_s12, 0 }
  0x45   : > { %p47_p11 = scmp.ne.s32.totalorder %s1472_s10, %s1468_s30  ;;  %p239_p13 = scmp.eq.s32.totalorder %s1563_s15, 1 }
  0x46   : > { %s1654_s29 = scalar_select %p32_p7, %s1476_s11, %s34_s28  }
  0x47   : > { %1185 = dma.hbm_to_vmem [thread:$0]  (!%p1577_p6), %s1848_s7, 1024, %s313_s20, [#allocation9], %s1485_s23, %s1485_s23, %s1486_s24  }
  0x48   : > { %p1656_p12 = por %p42_p10, %p41_p9  ;;  %p1662_p6 = por %p1835_p1, %p47_p11 }
  0x49   : > { %p245_p0 = scmp.eq.s32.totalorder %s981_s19, 1  ;;  %p1198_p2 = scmp.lt.s32.totalorder %s1480_s12, 2 }
  0x4a   : > { %s1850_s23 = scalar_select %p1662_p6, 1, 0 }
  0x4b   : > { %s329_s24 = sand.u32 1, %s1476_s11   ;;  %p1669_p5 = por %p239_p13, %p41_p9 }
  0x4c   : > { %p1673_p8 = por %p245_p0, %p47_p11  ;;  %s988_s18 = sshll.u32 %s329_s24, 2 }
  0x4d   : > { %s1851_s14 = scalar_select %p1669_p5, 1, 0 }
  0x4e   : > { %s1852_s17 = scalar_select %p1673_p8, 1, 0 }
  0x4f   : > { %s989_s20 = sshll.u32 %s1480_s12, 6  ;;  %s333_s19 = scalar_lea.vmem [#allocation2], %s988_s18 }
  0x50   : > { %s1681_s25 = scalar_lea.hbm %s1825_s0, %s989_s20  ;;  %s340_s27 = sshll.u32 %s333_s19, 4  ;;  %s341_s27 = int_to_ptr.vmem [resolvable:$true] %s340_s27 }
  0x51   : > { %p1685_p7 = pnand %p1198_p2, %p1656_p12  ;;  %s330_s1 = scalar_lea.sflag [#allocation3], %s329_s24 }
  0x52   : > { %s1380_s3 = scalar_lea.hbm %s1681_s25, 64  ;;  %s1385_s21 = scalar_lea.hbm %s1825_s0, 128 }
  0x53   : > { %p1381_p9 = scmp.ne.s32.totalorder %s1681_s25, %s1380_s3  ;;  %p1382_p10 = pneg %p1685_p7 }
  0x54   : > { %p1386_p0 = scmp.lt.s32.totalorder %s1681_s25, %s1825_s0  ;;  %p1387_p12 = scmp.lt.s32.totalorder %s1385_s21, %s1380_s3 }
  0x55   : > { %p1383_p11 = pnand %p1382_p10, %p1381_p9 }
  0x56   : > { %p1388_p2 = por %p1387_p12, %p1386_p0 }
  0x57   : > { %p1384_p13 = pneg %p1383_p11 }
  0x59   : > { %p1389_p4 = pnand %p1388_p2, %p1384_p13 }
  0x5b   : > { %1392 = shalt.err (!%p1389_p4)
}
  0x5c   : > { %s1393_s13 = scalar_lea.vmem %s341_s27, 64  ;;  %s1488_s24 = smov [#allocation2]  }
  0x5d   : > { %p1394_p1 = scmp.ne.s32.totalorder %s341_s27, %s1393_s13  ;;  %s1398_s5 = sshll.u32 %s1488_s24, 4  ;;  %s1399_s5 = int_to_ptr.vmem [resolvable:$false] %s1398_s5 }
  0x5e   : > { %s1400_s7 = scalar_lea.vmem %s1399_s5, 128  ;;  %p1401_p9 = scmp.lt.s32.totalorder %s341_s27, %s1399_s5 }
  0x5f   : > { %p1396_p8 = pnand %p1394_p1, %p1382_p10  ;;  %p1402_p11 = scmp.lt.s32.totalorder %s1400_s7, %s1393_s13 }
  0x61   : > { %p1397_p5 = pneg %p1396_p8  ;;  %p1403_p6 = por %p1402_p11, %p1401_p9 }
  0x63   : > { %p1404_p3 = pnand %p1403_p6, %p1397_p5 }
  0x65   : > { %1407 = shalt.err (!%p1404_p3)
}
  0x66   : > { %1189 = dma.hbm_to_vmem [thread:$0]  (!%p1685_p7), %s1681_s25, 64, %s341_s27, %s330_s1  }
  0x67   : > { %p1854_p13 = scmp.ne.s32.totalorder %s1843_s16, 0 }
  0x68   : > { %s1706_s3 = sand.u32 (!%p1854_p13), 1, %s1472_s10   ;;  %p1855_p1 = scmp.ne.s32.totalorder (!%p1854_p13), %s1850_s23, 0 }
  0x69   : > { %349 = sbr.rel (%p1854_p13) target bundleno = 957 (0x3bd), region = 56  ;;  %s991_s20 = sshll.u32 (!%p1854_p13), %s1706_s3, 2 }
  0x6a   : > { %s352_s22 = scalar_lea.sflag (!%p1854_p13), [#allocation3], %s1706_s3  ;;  %s1710_s5 = scalar_lea.vmem (!%p1854_p13), [#allocation2], %s991_s20 }
  0x6e   : > { %1451 = dma.done.wait (%p1855_p1), %s352_s22, 64  }
  0x6f   : > { %1453 = vsyncadd (%p1855_p1), %s352_s22, 4294967232  ;;  %p1856_p3 = scmp.eq.s32.totalorder %s1563_s15, 0 }
  0x71   : > { %1455 = dma.done.wait (%p1856_p3), [#allocation6], 2048   ;;  %p1857_p4 = pmov %p1856_p3 }
  0x72   : > { %p1858_p6 = pmov %p1856_p3 }
  0x73   : > { %1457 = vsyncadd (%p1857_p4), [#allocation6], 4294965248 }
  0x74   : > { %1459 = dma.done.wait (%p1858_p6), [#allocation9], 2048   ;;  %p1859_p5 = pmov %p1856_p3 }
  0x75   : > { %v1489_v0 = vmov 0.0   ;;  %vm1490_vm0 = vmmov 0   ;;  %v1244_v1 = vld [vmem:[#allocation5 + $0x38] sm:$0xff]   ;;  %v1245_v2 = vld [vmem:[#allocation5 + $0x30] sm:$0xff]   ;;  %v1246_v3 = vld [vmem:[#allocation5 + $0x28] sm:$0xff]   ;;  %s996_s28 = sshll.u32 %s1706_s3, 3 }
  0x76   : > { %1461 = vsyncadd (%p1859_p5), [#allocation9], 4294965248  ;;  %1073 = vmatprep.subr.bf16.mxu0 %v1489_v0  ;;  %1089 = vmatprep.mubr.msk.bf16.mxu0 %vm1490_vm0, %v1489_v0  ;;  %v1252_v4 = vld [vmem:[#allocation7 + $0x38] sm:$0xff]   ;;  %v1247_v5 = vld [vmem:[#allocation5 + $0x20] sm:$0xff]   ;;  %s1034_s19 = sshll.u32 %s1563_s15, 7  ;;  %s405_s13 = scalar_lea.vmem [#allocation11], %s996_s28 }
  0x77   : > { %1093 = vmatprep.subr.bf16.mxu1 %v1489_v0  ;;  %1109 = vmatprep.mubr.msk.bf16.mxu1 %vm1490_vm0, %v1489_v0  ;;  %v1253_v6 = vld [vmem:[#allocation7 + $0x30] sm:$0xff]   ;;  %v1248_v7 = vld [vmem:[#allocation5 + $0x18] sm:$0xff]   ;;  %v1254_v8 = vld [vmem:[#allocation7 + $0x28] sm:$0xff]   ;;  %s873_s24 = sshll.u32 %s405_s13, 4  ;;  %s860_s1 = scalar_lea.sflag [#allocation4], %s1706_s3  ;;  %s1784_s24 = int_to_ptr.vmem [resolvable:$true] %s873_s24 }
  0x78   : > { %1074 = vmatpush3.bf16.msra.mxu0 %v1244_v1  ;;  %1094 = vmatpush3.bf16.msra.mxu1 %v1252_v4  ;;  %v1249_v9 = vld [vmem:[#allocation5 + $0x10] sm:$0xff]   ;;  %v1255_v10 = vld [vmem:[#allocation7 + $0x20] sm:$0xff]   ;;  %v1250_v11 = vld [vmem:[#allocation5 + $0x8] sm:$0xff]   ;;  %s1408_s7 = scalar_lea.vmem %s1784_s24, 128  ;;  %p1860_p7 = scmp.ne.s32.totalorder %s1851_s14, 0 }
  0x79   : > { %1075 = vmatprep.subr.bf16.mxu0 %v1489_v0  ;;  %1095 = vmatprep.subr.bf16.mxu1 %v1489_v0  ;;  %v1256_v12 = vld [vmem:[#allocation7 + $0x18] sm:$0xff]   ;;  %v1251_v13 = vld [vmem:[#allocation5] sm:$0xff]   ;;  %v1257_v14 = vld [vmem:[#allocation7 + $0x10] sm:$0xff]   ;;  %p1409_p8 = scmp.ne.s32.totalorder %s1784_s24, %s1408_s7  ;;  %s1491_s15 = smov [#allocation11]  }
  0x7a   : > { %v407_v15 = vld [vmem:[%s1710_s5] sm:$0xf]  ;;  %v1258_v16 = vld [vmem:[#allocation7 + $0x8] sm:$0xff]   ;;  %v1259_v17 = vld [vmem:[#allocation7] sm:$0xff]   ;;  %s1782_s5 = scalar_lea.hbm %s1834_s9, %s1034_s19  ;;  %s1412_s16 = sshll.u32 %s1491_s15, 4  ;;  %s1413_s16 = int_to_ptr.vmem [resolvable:$false] %s1412_s16 }
  0x7b   : > { %v1260_v18 = vld [vmem:[#allocation8 + $0x38] sm:$0xff]   ;;  %v1261_v19 = vld [vmem:[#allocation8 + $0x30] sm:$0xff]   ;;  %v1262_v20 = vld [vmem:[#allocation8 + $0x28] sm:$0xff]   ;;  %p1410_p10 = pnand %p1409_p8, %p1860_p7  ;;  %s1414_s23 = scalar_lea.vmem %s1413_s16, 256 }
  0x7c   : > { %1076 = vmatpush3.bf16.msra.mxu0 %v1245_v2  ;;  %1096 = vmatpush3.bf16.msra.mxu1 %v1253_v6  ;;  %v1263_v21 = vld [vmem:[#allocation8 + $0x20] sm:$0xff]   ;;  %v1264_v22 = vld [vmem:[#allocation8 + $0x18] sm:$0xff]   ;;  %v1265_v23 = vld [vmem:[#allocation8 + $0x10] sm:$0xff]   ;;  %p1415_p12 = scmp.lt.s32.totalorder %s1784_s24, %s1413_s16  ;;  %p1416_p2 = scmp.lt.s32.totalorder %s1414_s23, %s1408_s7 }
  0x7d   : > { %1077 = vmatprep.subr.bf16.mxu0 %v1489_v0  ;;  %1097 = vmatprep.subr.bf16.mxu1 %v1489_v0  ;;  %v997_v24 = vld [vmem:[%s1827_s2] ss:$0 sm:$0xff]  ;;  %v1266_v32 = vld [vmem:[#allocation8 + $0x8] sm:$0xff]   ;;  %v1267_v33 = vld [vmem:[#allocation8] sm:$0xff]   ;;  %p1411_p0 = pneg %p1410_p10 }
  0x7e   : > { %v1268_v34 = vld [vmem:[#allocation10 + $0x38] sm:$0xff]   ;;  %v1269_v35 = vld [vmem:[#allocation10 + $0x30] sm:$0xff]   ;;  %v1270_v36 = vld [vmem:[#allocation10 + $0x28] sm:$0xff]   ;;  %p1417_p9 = por %p1416_p2, %p1415_p12 }
  0x7f   : > { %v1271_v37 = vld [vmem:[#allocation10 + $0x20] sm:$0xff]   ;;  %v1272_v38 = vld [vmem:[#allocation10 + $0x18] sm:$0xff]   ;;  %v1273_v39 = vld [vmem:[#allocation10 + $0x10] sm:$0xff]  }
  0x80   : > { %1078 = vmatpush3.bf16.msra.mxu0 %v1246_v3  ;;  %1098 = vmatpush3.bf16.msra.mxu1 %v1254_v8  ;;  %v1006_v40 = vld [vmem:[%s1829_s4] ss:$0 sm:$0xff]  ;;  %v1274_v48 = vld [vmem:[#allocation10 + $0x8] sm:$0xff]   ;;  %v1275_v49 = vld [vmem:[#allocation10] sm:$0xff]   ;;  %p1418_p11 = pnand %p1417_p9, %p1411_p0 }
  0x81   : > { %1079 = vmatprep.subr.bf16.mxu0 %v1489_v0  ;;  %1099 = vmatprep.subr.bf16.mxu1 %v1489_v0  ;;  %v1015_v50 = vld [vmem:[%s1831_s6] ss:$0 sm:$0xff] }
  0x82   : > { %v1024_v58 = vld [vmem:[%s1833_s8] ss:$0 sm:$0xff] }
  0x84   : > { %1080 = vmatpush3.bf16.msra.mxu0 %v1247_v5  ;;  %1100 = vmatpush3.bf16.msra.mxu1 %v1255_v10 }
  0x85   : > { %1081 = vmatprep.subr.bf16.mxu0 %v1489_v0  ;;  %1101 = vmatprep.subr.bf16.mxu1 %v1489_v0 }
  0x88   : > { %1082 = vmatpush3.bf16.msra.mxu0 %v1248_v7  ;;  %1102 = vmatpush3.bf16.msra.mxu1 %v1256_v12 }
  0x89   : > { %1083 = vmatprep.subr.bf16.mxu0 %v1489_v0  ;;  %1103 = vmatprep.subr.bf16.mxu1 %v1489_v0 }
  0x8c   : > { %1084 = vmatpush3.bf16.msra.mxu0 %v1249_v9  ;;  %1104 = vmatpush3.bf16.msra.mxu1 %v1257_v14 }
  0x8d   : > { %1085 = vmatprep.subr.bf16.mxu0 %v1489_v0  ;;  %1105 = vmatprep.subr.bf16.mxu1 %v1489_v0 }
  0x90   : > { %1086 = vmatpush3.bf16.msra.mxu0 %v1250_v11  ;;  %1106 = vmatpush3.bf16.msra.mxu1 %v1258_v16 }
  0x91   : > { %1087 = vmatprep.subr.bf16.mxu0 %v1489_v0  ;;  %1107 = vmatprep.subr.bf16.mxu1 %v1489_v0 }
  0x94   : > { %1088 = vmatpush3.bf16.msra.mxu0 %v1251_v13  ;;  %1108 = vmatpush3.bf16.msra.mxu1 %v1259_v17 }
  0x95   : > { %1113 = vmatprep.subr.bf16.mxu0 %v1489_v0  ;;  %1133 = vmatprep.subr.bf16.mxu1 %v1489_v0 }
  0x97   : > { %1090 = vmatmul.mubr.bf16.vlgmr.msra.gmra.mxu0 %v407_v15 }
  0x98   : > { %1129 = vmatprep.mubr.msk.bf16.mxu0 %vm1490_vm0, %v1489_v0  ;;  %1114 = vmatpush3.bf16.msra.mxu0 %v1260_v18 }
  0x99   : > { %1115 = vmatprep.subr.bf16.mxu0 %v1489_v0 }
  0x9c   : > { %1116 = vmatpush3.bf16.msra.mxu0 %v1261_v19 }
  0x9d   : > { %1117 = vmatprep.subr.bf16.mxu0 %v1489_v0 }
  0xa0   : > { %1118 = vmatpush3.bf16.msra.mxu0 %v1262_v20 }
  0xa1   : > { %1119 = vmatprep.subr.bf16.mxu0 %v1489_v0 }
  0xa4   : > { %1120 = vmatpush3.bf16.msra.mxu0 %v1263_v21 }
  0xa5   : > { %1121 = vmatprep.subr.bf16.mxu0 %v1489_v0 }
  0xa8   : > { %1122 = vmatpush3.bf16.msra.mxu0 %v1264_v22 }
  0xa9   : > { %1123 = vmatprep.subr.bf16.mxu0 %v1489_v0 }
  0xac   : > { %1124 = vmatpush3.bf16.msra.mxu0 %v1265_v23 }
  0xad   : > { %1125 = vmatprep.subr.bf16.mxu0 %v1489_v0 }
  0xb0   : > { %1126 = vmatpush3.bf16.msra.mxu0 %v1266_v32 }
  0xb1   : > { %1127 = vmatprep.subr.bf16.mxu0 %v1489_v0 }
  0xb4   : > { %1128 = vmatpush3.bf16.msra.mxu0 %v1267_v33 }
 0x157   : > { %v513_v25 = vpop.f32.mrf.mxu0 }
 0x158   : > { %v514_v26 = vadd.f32 %v997_v24, %v513_v25 }
 0x159   : > { %v1091_v27 = vpop.f32.mrf.mxu0 }
 0x15a   : > { %v519_v28 = vmax.f32 %v514_v26, 0.0 }
 0x15b   : > { %v516_v29 = vpop.f32.mrf.mxu0 }
 0x15c   : > { %v520_v30 = vpack.c.bf16 %v519_v28, %v519_v28 }
 0x15d   : > { %v1092_v31 = vpop.f32.mrf.mxu0 }
 0x15e   : > { %1110 = vmatmul.mubr.bf16.vlgmr.msra.gmra.mxu1 %v520_v30 }
 0x15f   : > { %1149 = vmatprep.mubr.msk.bf16.mxu1 %vm1490_vm0, %v1489_v0  ;;  %1134 = vmatpush3.bf16.msra.mxu1 %v1268_v34 }
 0x160   : > { %1135 = vmatprep.subr.bf16.mxu1 %v1489_v0 }
 0x163   : > { %1136 = vmatpush3.bf16.msra.mxu1 %v1269_v35 }
 0x164   : > { %1137 = vmatprep.subr.bf16.mxu1 %v1489_v0 }
 0x167   : > { %1138 = vmatpush3.bf16.msra.mxu1 %v1270_v36 }
 0x168   : > { %1139 = vmatprep.subr.bf16.mxu1 %v1489_v0 }
 0x16b   : > { %1140 = vmatpush3.bf16.msra.mxu1 %v1271_v37 }
 0x16c   : > { %1141 = vmatprep.subr.bf16.mxu1 %v1489_v0 }
 0x16f   : > { %1142 = vmatpush3.bf16.msra.mxu1 %v1272_v38 }
 0x170   : > { %1143 = vmatprep.subr.bf16.mxu1 %v1489_v0 }
 0x173   : > { %1144 = vmatpush3.bf16.msra.mxu1 %v1273_v39 }
 0x174   : > { %1145 = vmatprep.subr.bf16.mxu1 %v1489_v0 }
 0x177   : > { %1146 = vmatpush3.bf16.msra.mxu1 %v1274_v48 }
 0x178   : > { %1147 = vmatprep.subr.bf16.mxu1 %v1489_v0 }
 0x17b   : > { %1148 = vmatpush3.bf16.msra.mxu1 %v1275_v49 }
 0x21e   : > { %v626_v41 = vpop.f32.mrf.mxu1 }
 0x21f   : > { %v627_v42 = vadd.f32 %v1006_v40, %v626_v41 }
 0x220   : > { %v1111_v43 = vpop.f32.mrf.mxu1 }
 0x221   : > { %v632_v44 = vmax.f32 %v627_v42, 0.0 }
 0x222   : > { %v629_v45 = vpop.f32.mrf.mxu1 }
 0x223   : > { %v633_v46 = vpack.c.bf16 %v632_v44, %v632_v44 }
 0x224   : > { %v1112_v47 = vpop.f32.mrf.mxu1 }
 0x225   : > { %1130 = vmatmul.mubr.bf16.vlgmr.msra.gmra.mxu0 %v633_v46 }
 0x2e5   : > { %v739_v51 = vpop.f32.mrf.mxu0 }
 0x2e6   : > { %v740_v52 = vadd.f32 %v1015_v50, %v739_v51 }
 0x2e7   : > { %v1131_v53 = vpop.f32.mrf.mxu0 }
 0x2e8   : > { %v745_v54 = vmax.f32 %v740_v52, 0.0 }
 0x2e9   : > { %v742_v55 = vpop.f32.mrf.mxu0 }
 0x2ea   : > { %v746_v56 = vpack.c.bf16 %v745_v54, %v745_v54 }
 0x2eb   : > { %v1132_v57 = vpop.f32.mrf.mxu0 }
 0x2ec   : > { %1150 = vmatmul.mubr.bf16.vlgmr.msra.gmra.mxu1 %v746_v56 }
 0x3ac   : > { %v852_v59 = vpop.f32.mrf.mxu1 }
 0x3ad   : > { %v853_v60 = vadd.f32 %v1024_v58, %v852_v59 }
 0x3ae   : > { %v1151_v61 = vpop.f32.mrf.mxu1 }
 0x3af   : > { %858 = vst [vmem:[%s405_s13] sm:$0xff] %v853_v60 }
 0x3b0   : > { %v855_v62 = vpop.f32.mrf.mxu1 }
 0x3b1   : > { %1421 = shalt.err (!%p1418_p11)
}
 0x3b2   : > { %s1422_s25 = scalar_lea.hbm %s1782_s5, 128  ;;  %s1426_s28 = scalar_lea.hbm %s1834_s9, 256 }
 0x3b3   : > { %p1423_p13 = scmp.ne.s32.totalorder %s1782_s5, %s1422_s25  ;;  %p1427_p4 = scmp.lt.s32.totalorder %s1782_s5, %s1834_s9 }
 0x3b4   : > { %p1428_p6 = scmp.lt.s32.totalorder %s1426_s28, %s1422_s25 }
 0x3b5   : > { %p1424_p1 = pnand %p1423_p13, %p1860_p7 }
 0x3b6   : > { %p1429_p5 = por %p1428_p6, %p1427_p4 }
 0x3b7   : > { %p1425_p3 = pneg %p1424_p1 }
 0x3b9   : > { %p1430_p8 = pnand %p1429_p5, %p1425_p3 }
 0x3bb   : > { %1433 = shalt.err (!%p1430_p8)
}
 0x3bc   : > { %1171 = dma.vmem_to_hbm [thread:$0]  (%p1860_p7), %s1784_s24, 128, %s1782_s5, %s860_s1   ;;  %v1152_v63 = vpop.f32.mrf.mxu1 }
 0x3bd PF: > { %s885_s19 = sand.u32 1, %s1468_s30   ;;  %p1861_p10 = scmp.ne.s32.totalorder %s1852_s17, 0 }
 0x3be   : > { %p1862_p0 = scmp.ge.s32.totalorder %s1480_s12, 2  ;;  %s886_s13 = scalar_lea.sflag [#allocation4], %s885_s19 }
 0x3c0   : > { %p1191_p12 = pnand %p1862_p0, %p1861_p10 }
 0x3c2   : > { %p1192_p2 = pneg %p1191_p12 }
 0x3c4   : > { %1463 = dma.done.wait (%p1192_p2), %s886_s13, 128  }
 0x3c5   : > { %1465 = vsyncadd (%p1192_p2), %s886_s13, 4294967168  ;;  %p24_p9 = scmp.ge.s32.totalorder %s1643_s26, 4   ;;  %s1863_s30 = smov %s1472_s10 }
 0x3c6   : > { %s1864_s10 = smov %s1476_s11  ;;  %s1865_s11 = smov %s1654_s29 }
 0x3c7   : > { %s1866_s12 = smov %s1643_s26  ;;  %26 = sbr.rel (!%p24_p9) target bundleno = 12 (0xc), region = 117 }
 0x3cc   :  { %891 = vsyncpa [#allocation3], 1 }
 0x3cd   :  { %893 = vsyncpa [#allocation3 + $0x1], 1 }
 0x3ce   :  { %894 = vsyncpa [#allocation6], 1 }
 0x3cf   :  { %895 = vsyncpa [#allocation9], 1 }
 0x3d0   :  { %896 = vsyncpa [#allocation4], 1 }
 0x3d1   :  { %898 = vsyncpa [#allocation4 + $0x1], 1 }

// kernel: tpu_custom_call.1
= control target key start
LH: loop header
LB: loop body
LE: loop exit
PB: predicated region body
PF: predicated region fallthrough
CT: control target
= control target key end

     0   :  { %s1825_s0 = inlined_call_operand.hbm [shape: bf16[16,128], index: 0, kind: input, shape index: {}]   ;;  %s1826_s1 = inlined_call_operand.hbm [shape: bf16[128,128], index: 1, kind: input, shape index: {}]   ;;  %s1827_s2 = inlined_call_operand.vmem [shape: f32[1,128], index: 2, kind: input, shape index: {}]   ;;  %s1828_s3 = inlined_call_operand.hbm [shape: bf16[128,128], index: 3, kind: input, shape index: {}]   ;;  %s1829_s4 = inlined_call_operand.vmem [shape: f32[1,128], index: 4, kind: input, shape index: {}]   ;;  %s1830_s5 = inlined_call_operand.hbm [shape: bf16[128,128], index: 5, kind: input, shape index: {}]   ;;  %s1831_s6 = inlined_call_operand.vmem [shape: f32[1,128], index: 6, kind: input, shape index: {}]   ;;  %s1832_s7 = inlined_call_operand.hbm [shape: bf16[128,128], index: 7, kind: input, shape index: {}]   ;;  %s1833_s8 = inlined_call_operand.vmem [shape: f32[1,128], index: 8, kind: input, shape index: {}]   ;;  %s1834_s9 = inlined_call_operand.hbm [shape: f32[16,128], index: 9, kind: output, shape index: {}]  }
   0x1   :  { %1839 = sst [smem:[#allocation16_spill]] %s1826_s1 }
   0x2   :  { %1840 = sst [smem:[#allocation17_spill]] %s1828_s3 }
   0x3   :  { %1841 = sst [smem:[#allocation18_spill]] %s1830_s5 }
   0x4   :  { %1842 = sst [smem:[#allocation19_spill]] %s1832_s7 }
   0x5   :  { %14 = vsyncpa [#allocation3], 0 }
   0x6   :  { %16 = vsyncpa [#allocation3 + $0x1], 0 }
   0x7   :  { %17 = vsyncpa [#allocation6], 0 }
   0x8   :  { %18 = vsyncpa [#allocation9], 0 }
   0x9   :  { %19 = vsyncpa [#allocation4], 0 }
   0xa   :  { %21 = vsyncpa [#allocation4 + $0x1], 0  ;;  %s1542_s30 = smov 0   ;;  %s1544_s10 = smov 0  }
   0xb   :  { %s1546_s11 = smov 0   ;;  %s1548_s12 = smov 0  }
   0xc LB: > { %s1482_s13 = smov [#allocation5]   ;;  %s1563_s15 = sadd.s32 4294967295, %s1480_s12   ;;  %s1480_s12 = sphi %s1548_s12, %s1866_s12   ;;  %s1476_s11 = sphi %s1546_s11, %s1865_s11   ;;  %s1472_s10 = sphi %s1544_s10, %s1864_s10   ;;  %s1468_s30 = sphi %s1542_s30, %s1863_s30  }
   0xd   : > { %s264_s14 = sshll.u32 %s1482_s13, 4  ;;  %p982_p0 = scmp.ge.s32.totalorder %s1480_s12, 1  ;;  %s265_s14 = int_to_ptr.vmem [resolvable:$true] %s264_s14 }
   0xe   : > { %p1835_p1 = scmp.eq.s32.totalorder %s1563_s15, 0  ;;  %p252_p2 = scmp.lt.s32.totalorder %s1480_s12, 3 }
   0xf   : > { %s1483_s17 = smov [#allocation8]   ;;  %s1484_s20 = smov [#allocation7]  }
  0x10   : > { %p1568_p3 = pnand %p982_p0, %p252_p2  ;;  %s296_s18 = sshll.u32 %s1483_s17, 4  ;;  %s1581_s18 = int_to_ptr.vmem [resolvable:$true] %s296_s18 }
  0x11   : > { %s280_s21 = sshll.u32 %s1484_s20, 4  ;;  %s1287_s22 = scalar_lea.vmem %s265_s14, 1024  ;;  %s1583_s21 = int_to_ptr.vmem [resolvable:$true] %s280_s21 }
  0x12   : > { %s1843_s16 = scalar_select %p1568_p3, 1, 0 }
  0x13   : > { %p1173_p5 = pneg %p1568_p3  ;;  %p1288_p8 = scmp.ne.s32.totalorder %s265_s14, %s1287_s22 }
  0x14   : > { %p1295_p11 = scmp.lt.s32.totalorder %s265_s14, %s265_s14  ;;  %p1296_p12 = scmp.lt.s32.totalorder %s1287_s22, %s1287_s22 }
  0x15   : > { %p1577_p6 = pnand %p1173_p5, %p1835_p1 }
  0x16   : > { %p1297_p13 = por %p1296_p12, %p1295_p11 }
  0x17   : > { %p1278_p7 = pneg %p1577_p6 }
  0x19   : > { %p1290_p9 = pnand %p1288_p8, %p1278_p7 }
  0x1b   : > { %p1291_p10 = pneg %p1290_p9 }
  0x1d   : > { %p1298_p0 = pnand %p1297_p13, %p1291_p10 }
  0x1f   : > { %1301 = shalt.err (!%p1298_p0)
}
  0x20   : > { %s1485_s23 = smov 64   ;;  %s1486_s24 = smov 4  }
  0x21   : > { %s1845_s1 = sld [smem:[#allocation16_spill]]  ;;  %s1313_s27 = scalar_lea.vmem %s1581_s18, 1024 }
  0x22   : > { %p1314_p2 = scmp.ne.s32.totalorder %s1581_s18, %s1313_s27  ;;  %p1321_p9 = scmp.lt.s32.totalorder %s1581_s18, %s1581_s18 }
  0x23   : > { %p1322_p10 = scmp.lt.s32.totalorder %s1313_s27, %s1313_s27 }
  0x24   : > { %p1316_p5 = pnand %p1314_p2, %p1278_p7 }
  0x25   : > { %p1323_p11 = por %p1322_p10, %p1321_p9 }
  0x26   : > { %p1317_p8 = pneg %p1316_p5 }
  0x27   : > { %1176 = dma.hbm_to_vmem [thread:$0]  (!%p1577_p6), %s1845_s1, 1024, %s265_s14, [#allocation6], %s1485_s23, %s1485_s23, %s1486_s24  }
  0x28   : > { %p1324_p12 = pnand %p1323_p11, %p1317_p8 }
  0x2a   : > { %1327 = shalt.err (!%p1324_p12)
}
  0x2b   : > { %s1846_s5 = sld [smem:[#allocation18_spill]]  ;;  %s1339_s13 = scalar_lea.vmem %s1583_s21, 1024 }
  0x2c   : > { %p1340_p13 = scmp.ne.s32.totalorder %s1583_s21, %s1339_s13  ;;  %p1347_p5 = scmp.lt.s32.totalorder %s1583_s21, %s1583_s21 }
  0x2d   : > { %p1348_p8 = scmp.lt.s32.totalorder %s1339_s13, %s1339_s13 }
  0x2e   : > { %p1342_p0 = pnand %p1340_p13, %p1278_p7 }
  0x2f   : > { %p1349_p9 = por %p1348_p8, %p1347_p5 }
  0x30   : > { %p1343_p2 = pneg %p1342_p0 }
  0x31   : > { %1182 = dma.hbm_to_vmem [thread:$0]  (!%p1577_p6), %s1846_s5, 1024, %s1581_s18, [#allocation9], %s1485_s23, %s1485_s23, %s1486_s24  }
  0x32   : > { %p1350_p10 = pnand %p1349_p9, %p1343_p2 }
  0x34   : > { %1353 = shalt.err (!%p1350_p10)
}
  0x35   : > { %s1847_s3 = sld [smem:[#allocation17_spill]]  ;;  %s1487_s18 = smov [#allocation10]  }
  0x36   : > { %s312_s20 = sshll.u32 %s1487_s18, 4  ;;  %s313_s20 = int_to_ptr.vmem [resolvable:$true] %s312_s20 }
  0x37   : > { %s1365_s22 = scalar_lea.vmem %s313_s20, 1024  ;;  %p1373_p0 = scmp.lt.s32.totalorder %s313_s20, %s313_s20 }
  0x38   : > { %p1366_p11 = scmp.ne.s32.totalorder %s313_s20, %s1365_s22  ;;  %p1374_p2 = scmp.lt.s32.totalorder %s1365_s22, %s1365_s22 }
  0x3a   : > { %p1368_p12 = pnand %p1366_p11, %p1278_p7  ;;  %p1375_p5 = por %p1374_p2, %p1373_p0 }
  0x3b   : > { %1179 = dma.hbm_to_vmem [thread:$0]  (!%p1577_p6), %s1847_s3, 1024, %s1583_s21, [#allocation6], %s1485_s23, %s1485_s23, %s1486_s24  }
  0x3c   : > { %p1369_p13 = pneg %p1368_p12 }
  0x3e   : > { %p1376_p8 = pnand %p1375_p5, %p1369_p13 }
  0x40   : > { %1379 = shalt.err (!%p1376_p8)
}
  0x41   : > { %s1848_s7 = sld [smem:[#allocation19_spill]]  ;;  %s981_s19 = sadd.s32 4294967294, %s1480_s12  }
  0x42   : > { %s1643_s26 = sadd.s32 1, %s1480_s12   ;;  %s34_s28 = sadd.s32 1, %s1476_s11 }
  0x43   : > { %s31_s27 = ssub.s32 %s1480_s12, %s1643_s26  ;;  %p41_p9 = scmp.ne.s32.totalorder %s1476_s11, %s1472_s10 }
  0x44   : > { %p32_p7 = scmp.eq.s32.totalorder %s31_s27, 0  ;;  %p42_p10 = scmp.eq.s32.totalorder %s1480_s12, 0 }
  0x45   : > { %p47_p11 = scmp.ne.s32.totalorder %s1472_s10, %s1468_s30  ;;  %p239_p13 = scmp.eq.s32.totalorder %s1563_s15, 1 }
  0x46   : > { %s1654_s29 = scalar_select %p32_p7, %s1476_s11, %s34_s28  }
  0x47   : > { %1185 = dma.hbm_to_vmem [thread:$0]  (!%p1577_p6), %s1848_s7, 1024, %s313_s20, [#allocation9], %s1485_s23, %s1485_s23, %s1486_s24  }
  0x48   : > { %p1656_p12 = por %p42_p10, %p41_p9  ;;  %p1662_p6 = por %p1835_p1, %p47_p11 }
  0x49   : > { %p245_p0 = scmp.eq.s32.totalorder %s981_s19, 1  ;;  %p1198_p2 = scmp.lt.s32.totalorder %s1480_s12, 2 }
  0x4a   : > { %s1850_s23 = scalar_select %p1662_p6, 1, 0 }
  0x4b   : > { %s329_s24 = sand.u32 1, %s1476_s11   ;;  %p1669_p5 = por %p239_p13, %p41_p9 }
  0x4c   : > { %p1673_p8 = por %p245_p0, %p47_p11  ;;  %s988_s18 = sshll.u32 %s329_s24, 2 }
  0x4d   : > { %s1851_s14 = scalar_select %p1669_p5, 1, 0 }
  0x4e   : > { %s1852_s17 = scalar_select %p1673_p8, 1, 0 }
  0x4f   : > { %s989_s20 = sshll.u32 %s1480_s12, 6  ;;  %s333_s19 = scalar_lea.vmem [#allocation2], %s988_s18 }
  0x50   : > { %s1681_s25 = scalar_lea.hbm %s1825_s0, %s989_s20  ;;  %s340_s27 = sshll.u32 %s333_s19, 4  ;;  %s341_s27 = int_to_ptr.vmem [resolvable:$true] %s340_s27 }
  0x51   : > { %p1685_p7 = pnand %p1198_p2, %p1656_p12  ;;  %s330_s1 = scalar_lea.sflag [#allocation3], %s329_s24 }
  0x52   : > { %s1380_s3 = scalar_lea.hbm %s1681_s25, 64  ;;  %s1385_s21 = scalar_lea.hbm %s1825_s0, 128 }
  0x53   : > { %p1381_p9 = scmp.ne.s32.totalorder %s1681_s25, %s1380_s3  ;;  %p1382_p10 = pneg %p1685_p7 }
  0x54   : > { %p1386_p0 = scmp.lt.s32.totalorder %s1681_s25, %s1825_s0  ;;  %p1387_p12 = scmp.lt.s32.totalorder %s1385_s21, %s1380_s3 }
  0x55   : > { %p1383_p11 = pnand %p1382_p10, %p1381_p9 }
  0x56   : > { %p1388_p2 = por %p1387_p12, %p1386_p0 }
  0x57   : > { %p1384_p13 = pneg %p1383_p11 }
  0x59   : > { %p1389_p4 = pnand %p1388_p2, %p1384_p13 }
  0x5b   : > { %1392 = shalt.err (!%p1389_p4)
}
  0x5c   : > { %s1393_s13 = scalar_lea.vmem %s341_s27, 64  ;;  %s1488_s24 = smov [#allocation2]  }
  0x5d   : > { %p1394_p1 = scmp.ne.s32.totalorder %s341_s27, %s1393_s13  ;;  %s1398_s5 = sshll.u32 %s1488_s24, 4  ;;  %s1399_s5 = int_to_ptr.vmem [resolvable:$false] %s1398_s5 }
  0x5e   : > { %s1400_s7 = scalar_lea.vmem %s1399_s5, 128  ;;  %p1401_p9 = scmp.lt.s32.totalorder %s341_s27, %s1399_s5 }
  0x5f   : > { %p1396_p8 = pnand %p1394_p1, %p1382_p10  ;;  %p1402_p11 = scmp.lt.s32.totalorder %s1400_s7, %s1393_s13 }
  0x61   : > { %p1397_p5 = pneg %p1396_p8  ;;  %p1403_p6 = por %p1402_p11, %p1401_p9 }
  0x63   : > { %p1404_p3 = pnand %p1403_p6, %p1397_p5 }
  0x65   : > { %1407 = shalt.err (!%p1404_p3)
}
  0x66   : > { %1189 = dma.hbm_to_vmem [thread:$0]  (!%p1685_p7), %s1681_s25, 64, %s341_s27, %s330_s1  }
  0x67   : > { %p1854_p13 = scmp.ne.s32.totalorder %s1843_s16, 0 }
  0x68   : > { %s1706_s3 = sand.u32 (!%p1854_p13), 1, %s1472_s10   ;;  %p1855_p1 = scmp.ne.s32.totalorder (!%p1854_p13), %s1850_s23, 0 }
  0x69   : > { %349 = sbr.rel (%p1854_p13) target bundleno = 957 (0x3bd), region = 56  ;;  %s991_s20 = sshll.u32 (!%p1854_p13), %s1706_s3, 2 }
  0x6a   : > { %s352_s22 = scalar_lea.sflag (!%p1854_p13), [#allocation3], %s1706_s3  ;;  %s1710_s5 = scalar_lea.vmem (!%p1854_p13), [#allocation2], %s991_s20 }
  0x6e   : > { %1451 = dma.done.wait (%p1855_p1), %s352_s22, 64  }
  0x6f   : > { %1453 = vsyncadd (%p1855_p1), %s352_s22, 4294967232  ;;  %p1856_p3 = scmp.eq.s32.totalorder %s1563_s15, 0 }
  0x71   : > { %1455 = dma.done.wait (%p1856_p3), [#allocation6], 2048   ;;  %p1857_p4 = pmov %p1856_p3 }
  0x72   : > { %p1858_p6 = pmov %p1856_p3 }
  0x73   : > { %1457 = vsyncadd (%p1857_p4), [#allocation6], 4294965248 }
  0x74   : > { %1459 = dma.done.wait (%p1858_p6), [#allocation9], 2048   ;;  %p1859_p5 = pmov %p1856_p3 }
  0x75   : > { %v1489_v0 = vmov 0.0   ;;  %vm1490_vm0 = vmmov 0   ;;  %v1244_v1 = vld [vmem:[#allocation5 + $0x38] sm:$0xff]   ;;  %v1245_v2 = vld [vmem:[#allocation5 + $0x30] sm:$0xff]   ;;  %v1246_v3 = vld [vmem:[#allocation5 + $0x28] sm:$0xff]   ;;  %s996_s28 = sshll.u32 %s1706_s3, 3 }
  0x76   : > { %1461 = vsyncadd (%p1859_p5), [#allocation9], 4294965248  ;;  %1073 = vmatprep.subr.bf16.mxu0 %v1489_v0  ;;  %1089 = vmatprep.mubr.msk.bf16.mxu0 %vm1490_vm0, %v1489_v0  ;;  %v1252_v4 = vld [vmem:[#allocation7 + $0x38] sm:$0xff]   ;;  %v1247_v5 = vld [vmem:[#allocation5 + $0x20] sm:$0xff]   ;;  %s1034_s19 = sshll.u32 %s1563_s15, 7  ;;  %s405_s13 = scalar_lea.vmem [#allocation11], %s996_s28 }
  0x77   : > { %1093 = vmatprep.subr.bf16.mxu1 %v1489_v0  ;;  %1109 = vmatprep.mubr.msk.bf16.mxu1 %vm1490_vm0, %v1489_v0  ;;  %v1253_v6 = vld [vmem:[#allocation7 + $0x30] sm:$0xff]   ;;  %v1248_v7 = vld [vmem:[#allocation5 + $0x18] sm:$0xff]   ;;  %v1254_v8 = vld [vmem:[#allocation7 + $0x28] sm:$0xff]   ;;  %s873_s24 = sshll.u32 %s405_s13, 4  ;;  %s860_s1 = scalar_lea.sflag [#allocation4], %s1706_s3  ;;  %s1784_s24 = int_to_ptr.vmem [resolvable:$true] %s873_s24 }
  0x78   : > { %1074 = vmatpush3.bf16.msra.mxu0 %v1244_v1  ;;  %1094 = vmatpush3.bf16.msra.mxu1 %v1252_v4  ;;  %v1249_v9 = vld [vmem:[#allocation5 + $0x10] sm:$0xff]   ;;  %v1255_v10 = vld [vmem:[#allocation7 + $0x20] sm:$0xff]   ;;  %v1250_v11 = vld [vmem:[#allocation5 + $0x8] sm:$0xff]   ;;  %s1408_s7 = scalar_lea.vmem %s1784_s24, 128  ;;  %p1860_p7 = scmp.ne.s32.totalorder %s1851_s14, 0 }
  0x79   : > { %1075 = vmatprep.subr.bf16.mxu0 %v1489_v0  ;;  %1095 = vmatprep.subr.bf16.mxu1 %v1489_v0  ;;  %v1256_v12 = vld [vmem:[#allocation7 + $0x18] sm:$0xff]   ;;  %v1251_v13 = vld [vmem:[#allocation5] sm:$0xff]   ;;  %v1257_v14 = vld [vmem:[#allocation7 + $0x10] sm:$0xff]   ;;  %p1409_p8 = scmp.ne.s32.totalorder %s1784_s24, %s1408_s7  ;;  %s1491_s15 = smov [#allocation11]  }
  0x7a   : > { %v407_v15 = vld [vmem:[%s1710_s5] sm:$0xf]  ;;  %v1258_v16 = vld [vmem:[#allocation7 + $0x8] sm:$0xff]   ;;  %v1259_v17 = vld [vmem:[#allocation7] sm:$0xff]   ;;  %s1782_s5 = scalar_lea.hbm %s1834_s9, %s1034_s19  ;;  %s1412_s16 = sshll.u32 %s1491_s15, 4  ;;  %s1413_s16 = int_to_ptr.vmem [resolvable:$false] %s1412_s16 }
  0x7b   : > { %v1260_v18 = vld [vmem:[#allocation8 + $0x38] sm:$0xff]   ;;  %v1261_v19 = vld [vmem:[#allocation8 + $0x30] sm:$0xff]   ;;  %v1262_v20 = vld [vmem:[#allocation8 + $0x28] sm:$0xff]   ;;  %p1410_p10 = pnand %p1409_p8, %p1860_p7  ;;  %s1414_s23 = scalar_lea.vmem %s1413_s16, 256 }
  0x7c   : > { %1076 = vmatpush3.bf16.msra.mxu0 %v1245_v2  ;;  %1096 = vmatpush3.bf16.msra.mxu1 %v1253_v6  ;;  %v1263_v21 = vld [vmem:[#allocation8 + $0x20] sm:$0xff]   ;;  %v1264_v22 = vld [vmem:[#allocation8 + $0x18] sm:$0xff]   ;;  %v1265_v23 = vld [vmem:[#allocation8 + $0x10] sm:$0xff]   ;;  %p1415_p12 = scmp.lt.s32.totalorder %s1784_s24, %s1413_s16  ;;  %p1416_p2 = scmp.lt.s32.totalorder %s1414_s23, %s1408_s7 }
  0x7d   : > { %1077 = vmatprep.subr.bf16.mxu0 %v1489_v0  ;;  %1097 = vmatprep.subr.bf16.mxu1 %v1489_v0  ;;  %v997_v24 = vld [vmem:[%s1827_s2] ss:$0 sm:$0xff]  ;;  %v1266_v32 = vld [vmem:[#allocation8 + $0x8] sm:$0xff]   ;;  %v1267_v33 = vld [vmem:[#allocation8] sm:$0xff]   ;;  %p1411_p0 = pneg %p1410_p10 }
  0x7e   : > { %v1268_v34 = vld [vmem:[#allocation10 + $0x38] sm:$0xff]   ;;  %v1269_v35 = vld [vmem:[#allocation10 + $0x30] sm:$0xff]   ;;  %v1270_v36 = vld [vmem:[#allocation10 + $0x28] sm:$0xff]   ;;  %p1417_p9 = por %p1416_p2, %p1415_p12 }
  0x7f   : > { %v1271_v37 = vld [vmem:[#allocation10 + $0x20] sm:$0xff]   ;;  %v1272_v38 = vld [vmem:[#allocation10 + $0x18] sm:$0xff]   ;;  %v1273_v39 = vld [vmem:[#allocation10 + $0x10] sm:$0xff]  }
  0x80   : > { %1078 = vmatpush3.bf16.msra.mxu0 %v1246_v3  ;;  %1098 = vmatpush3.bf16.msra.mxu1 %v1254_v8  ;;  %v1006_v40 = vld [vmem:[%s1829_s4] ss:$0 sm:$0xff]  ;;  %v1274_v48 = vld [vmem:[#allocation10 + $0x8] sm:$0xff]   ;;  %v1275_v49 = vld [vmem:[#allocation10] sm:$0xff]   ;;  %p1418_p11 = pnand %p1417_p9, %p1411_p0 }
  0x81   : > { %1079 = vmatprep.subr.bf16.mxu0 %v1489_v0  ;;  %1099 = vmatprep.subr.bf16.mxu1 %v1489_v0  ;;  %v1015_v50 = vld [vmem:[%s1831_s6] ss:$0 sm:$0xff] }
  0x82   : > { %v1024_v58 = vld [vmem:[%s1833_s8] ss:$0 sm:$0xff] }
  0x84   : > { %1080 = vmatpush3.bf16.msra.mxu0 %v1247_v5  ;;  %1100 = vmatpush3.bf16.msra.mxu1 %v1255_v10 }
  0x85   : > { %1081 = vmatprep.subr.bf16.mxu0 %v1489_v0  ;;  %1101 = vmatprep.subr.bf16.mxu1 %v1489_v0 }
  0x88   : > { %1082 = vmatpush3.bf16.msra.mxu0 %v1248_v7  ;;  %1102 = vmatpush3.bf16.msra.mxu1 %v1256_v12 }
  0x89   : > { %1083 = vmatprep.subr.bf16.mxu0 %v1489_v0  ;;  %1103 = vmatprep.subr.bf16.mxu1 %v1489_v0 }
  0x8c   : > { %1084 = vmatpush3.bf16.msra.mxu0 %v1249_v9  ;;  %1104 = vmatpush3.bf16.msra.mxu1 %v1257_v14 }
  0x8d   : > { %1085 = vmatprep.subr.bf16.mxu0 %v1489_v0  ;;  %1105 = vmatprep.subr.bf16.mxu1 %v1489_v0 }
  0x90   : > { %1086 = vmatpush3.bf16.msra.mxu0 %v1250_v11  ;;  %1106 = vmatpush3.bf16.msra.mxu1 %v1258_v16 }
  0x91   : > { %1087 = vmatprep.subr.bf16.mxu0 %v1489_v0  ;;  %1107 = vmatprep.subr.bf16.mxu1 %v1489_v0 }
  0x94   : > { %1088 = vmatpush3.bf16.msra.mxu0 %v1251_v13  ;;  %1108 = vmatpush3.bf16.msra.mxu1 %v1259_v17 }
  0x95   : > { %1113 = vmatprep.subr.bf16.mxu0 %v1489_v0  ;;  %1133 = vmatprep.subr.bf16.mxu1 %v1489_v0 }
  0x97   : > { %1090 = vmatmul.mubr.bf16.vlgmr.msra.gmra.mxu0 %v407_v15 }
  0x98   : > { %1129 = vmatprep.mubr.msk.bf16.mxu0 %vm1490_vm0, %v1489_v0  ;;  %1114 = vmatpush3.bf16.msra.mxu0 %v1260_v18 }
  0x99   : > { %1115 = vmatprep.subr.bf16.mxu0 %v1489_v0 }
  0x9c   : > { %1116 = vmatpush3.bf16.msra.mxu0 %v1261_v19 }
  0x9d   : > { %1117 = vmatprep.subr.bf16.mxu0 %v1489_v0 }
  0xa0   : > { %1118 = vmatpush3.bf16.msra.mxu0 %v1262_v20 }
  0xa1   : > { %1119 = vmatprep.subr.bf16.mxu0 %v1489_v0 }
  0xa4   : > { %1120 = vmatpush3.bf16.msra.mxu0 %v1263_v21 }
  0xa5   : > { %1121 = vmatprep.subr.bf16.mxu0 %v1489_v0 }
  0xa8   : > { %1122 = vmatpush3.bf16.msra.mxu0 %v1264_v22 }
  0xa9   : > { %1123 = vmatprep.subr.bf16.mxu0 %v1489_v0 }
  0xac   : > { %1124 = vmatpush3.bf16.msra.mxu0 %v1265_v23 }
  0xad   : > { %1125 = vmatprep.subr.bf16.mxu0 %v1489_v0 }
  0xb0   : > { %1126 = vmatpush3.bf16.msra.mxu0 %v1266_v32 }
  0xb1   : > { %1127 = vmatprep.subr.bf16.mxu0 %v1489_v0 }
  0xb4   : > { %1128 = vmatpush3.bf16.msra.mxu0 %v1267_v33 }
 0x157   : > { %v513_v25 = vpop.f32.mrf.mxu0 }
 0x158   : > { %v514_v26 = vadd.f32 %v997_v24, %v513_v25 }
 0x159   : > { %v1091_v27 = vpop.f32.mrf.mxu0 }
 0x15a   : > { %v519_v28 = vmax.f32 %v514_v26, 0.0 }
 0x15b   : > { %v516_v29 = vpop.f32.mrf.mxu0 }
 0x15c   : > { %v520_v30 = vpack.c.bf16 %v519_v28, %v519_v28 }
 0x15d   : > { %v1092_v31 = vpop.f32.mrf.mxu0 }
 0x15e   : > { %1110 = vmatmul.mubr.bf16.vlgmr.msra.gmra.mxu1 %v520_v30 }
 0x15f   : > { %1149 = vmatprep.mubr.msk.bf16.mxu1 %vm1490_vm0, %v1489_v0  ;;  %1134 = vmatpush3.bf16.msra.mxu1 %v1268_v34 }
 0x160   : > { %1135 = vmatprep.subr.bf16.mxu1 %v1489_v0 }
 0x163   : > { %1136 = vmatpush3.bf16.msra.mxu1 %v1269_v35 }
 0x164   : > { %1137 = vmatprep.subr.bf16.mxu1 %v1489_v0 }
 0x167   : > { %1138 = vmatpush3.bf16.msra.mxu1 %v1270_v36 }
 0x168   : > { %1139 = vmatprep.subr.bf16.mxu1 %v1489_v0 }
 0x16b   : > { %1140 = vmatpush3.bf16.msra.mxu1 %v1271_v37 }
 0x16c   : > { %1141 = vmatprep.subr.bf16.mxu1 %v1489_v0 }
 0x16f   : > { %1142 = vmatpush3.bf16.msra.mxu1 %v1272_v38 }
 0x170   : > { %1143 = vmatprep.subr.bf16.mxu1 %v1489_v0 }
 0x173   : > { %1144 = vmatpush3.bf16.msra.mxu1 %v1273_v39 }
 0x174   : > { %1145 = vmatprep.subr.bf16.mxu1 %v1489_v0 }
 0x177   : > { %1146 = vmatpush3.bf16.msra.mxu1 %v1274_v48 }
 0x178   : > { %1147 = vmatprep.subr.bf16.mxu1 %v1489_v0 }
 0x17b   : > { %1148 = vmatpush3.bf16.msra.mxu1 %v1275_v49 }
 0x21e   : > { %v626_v41 = vpop.f32.mrf.mxu1 }
 0x21f   : > { %v627_v42 = vadd.f32 %v1006_v40, %v626_v41 }
 0x220   : > { %v1111_v43 = vpop.f32.mrf.mxu1 }
 0x221   : > { %v632_v44 = vmax.f32 %v627_v42, 0.0 }
 0x222   : > { %v629_v45 = vpop.f32.mrf.mxu1 }
 0x223   : > { %v633_v46 = vpack.c.bf16 %v632_v44, %v632_v44 }
 0x224   : > { %v1112_v47 = vpop.f32.mrf.mxu1 }
 0x225   : > { %1130 = vmatmul.mubr.bf16.vlgmr.msra.gmra.mxu0 %v633_v46 }
 0x2e5   : > { %v739_v51 = vpop.f32.mrf.mxu0 }
 0x2e6   : > { %v740_v52 = vadd.f32 %v1015_v50, %v739_v51 }
 0x2e7   : > { %v1131_v53 = vpop.f32.mrf.mxu0 }
 0x2e8   : > { %v745_v54 = vmax.f32 %v740_v52, 0.0 }
 0x2e9   : > { %v742_v55 = vpop.f32.mrf.mxu0 }
 0x2ea   : > { %v746_v56 = vpack.c.bf16 %v745_v54, %v745_v54 }
 0x2eb   : > { %v1132_v57 = vpop.f32.mrf.mxu0 }
 0x2ec   : > { %1150 = vmatmul.mubr.bf16.vlgmr.msra.gmra.mxu1 %v746_v56 }
 0x3ac   : > { %v852_v59 = vpop.f32.mrf.mxu1 }
 0x3ad   : > { %v853_v60 = vadd.f32 %v1024_v58, %v852_v59 }
 0x3ae   : > { %v1151_v61 = vpop.f32.mrf.mxu1 }
 0x3af   : > { %858 = vst [vmem:[%s405_s13] sm:$0xff] %v853_v60 }
 0x3b0   : > { %v855_v62 = vpop.f32.mrf.mxu1 }
 0x3b1   : > { %1421 = shalt.err (!%p1418_p11)
}
 0x3b2   : > { %s1422_s25 = scalar_lea.hbm %s1782_s5, 128  ;;  %s1426_s28 = scalar_lea.hbm %s1834_s9, 256 }
 0x3b3   : > { %p1423_p13 = scmp.ne.s32.totalorder %s1782_s5, %s1422_s25  ;;  %p1427_p4 = scmp.lt.s32.totalorder %s1782_s5, %s1834_s9 }
 0x3b4   : > { %p1428_p6 = scmp.lt.s32.totalorder %s1426_s28, %s1422_s25 }
 0x3b5   : > { %p1424_p1 = pnand %p1423_p13, %p1860_p7 }
 0x3b6   : > { %p1429_p5 = por %p1428_p6, %p1427_p4 }
 0x3b7   : > { %p1425_p3 = pneg %p1424_p1 }
 0x3b9   : > { %p1430_p8 = pnand %p1429_p5, %p1425_p3 }
 0x3bb   : > { %1433 = shalt.err (!%p1430_p8)
}
 0x3bc   : > { %1171 = dma.vmem_to_hbm [thread:$0]  (%p1860_p7), %s1784_s24, 128, %s1782_s5, %s860_s1   ;;  %v1152_v63 = vpop.f32.mrf.mxu1 }
 0x3bd PF: > { %s885_s19 = sand.u32 1, %s1468_s30   ;;  %p1861_p10 = scmp.ne.s32.totalorder %s1852_s17, 0 }
 0x3be   : > { %p1862_p0 = scmp.ge.s32.totalorder %s1480_s12, 2  ;;  %s886_s13 = scalar_lea.sflag [#allocation4], %s885_s19 }
 0x3c0   : > { %p1191_p12 = pnand %p1862_p0, %p1861_p10 }
 0x3c2   : > { %p1192_p2 = pneg %p1191_p12 }
 0x3c4   : > { %1463 = dma.done.wait (%p1192_p2), %s886_s13, 128  }
 0x3c5   : > { %1465 = vsyncadd (%p1192_p2), %s886_s13, 4294967168  ;;  %p24_p9 = scmp.ge.s32.totalorder %s1643_s26, 4   ;;  %s1863_s30 = smov %s1472_s10 }
 0x3c6   : > { %s1864_s10 = smov %s1476_s11  ;;  %s1865_s11 = smov %s1654_s29 }
 0x3c7   : > { %s1866_s12 = smov %s1643_s26  ;;  %26 = sbr.rel (!%p24_p9) target bundleno = 12 (0xc), region = 117 }
 0x3cc   :  { %891 = vsyncpa [#allocation3], 1 }
 0x3cd   :  { %893 = vsyncpa [#allocation3 + $0x1], 1 }
 0x3ce   :  { %894 = vsyncpa [#allocation6], 1 }
 0x3cf   :  { %895 = vsyncpa [#allocation9], 1 }
 0x3d0   :  { %896 = vsyncpa [#allocation4], 1 }
 0x3d1   :  { %898 = vsyncpa [#allocation4 + $0x1], 1 }

</bundles_post_ra>
